<compile_context>
chip_gen: v7x
topology: tpu7x:2x2x1
jax: 0.10.0
libtpu: 0.0.40
codegen_flags: <defaults>
</compile_context>

<pallas_src>
import functools

import jax
import jax.numpy as jnp
from jax import lax
from jax.experimental import pallas as pl
from jax.experimental.pallas import tpu as pltpu


def _round_up(x, m):
    return ((x + m - 1) // m) * m


def _fused_dwsep_kernel(xph_ref, wf_ref, bf_ref, o_ref, *,
                        kh_size, kw_size, stride, tile_oh, ow_p, cout, kf,
                        mxu_dtype):
    """One output row tile of the fused depthwise-separable conv.

    xph_ref : (stride*stride, Hs, Ws, Cin)  phase-split padded image (resident)
    wf_ref  : (KH*KW*Cin, Cout)             fused weights
    bf_ref  : (1, Cout)                     fused bias
    o_ref   : (1, tile_oh, OW_p, Cout)      output row tile
    """
    r = pl.program_id(1)
    row0 = pl.multiple_of(r * tile_oh, tile_oh)

    # im2col: one contiguous slice per tap (the wrapper-side phase split already
    # absorbed the stride), concatenated along lanes -> (tile_oh, OW_p, Kf).
    pieces = []
    for kh in range(kh_size):
        for kw in range(kw_size):
            ph = (kh % stride) * stride + (kw % stride)
            col0 = kw // stride
            win = xph_ref[ph, pl.ds(row0 + kh // stride, tile_oh),
                          col0:col0 + ow_p, :]
            pieces.append(win)
    patch = pieces[0] if len(pieces) == 1 else jnp.concatenate(pieces, axis=-1)

    # Single MXU matmul with contraction depth KH*KW*Cin, f32 accumulation.
    # OW_p is a multiple of the sublane pack, so these reshapes do not retile.
    patch2d = patch.reshape(tile_oh * ow_p, kf).astype(mxu_dtype)
    y = jnp.dot(patch2d, wf_ref[...].astype(mxu_dtype),
                preferred_element_type=jnp.float32)
    y = y + bf_ref[...].astype(jnp.float32)
    o_ref[0] = y.reshape(tile_oh, ow_p, cout).astype(o_ref.dtype)


def _pick_tile_oh(oh, ow_p, kf, cout, budget_bytes=64 << 10):
    """Largest row tile whose live fp32 values (im2col patch + matmul result)
    stay comfortably inside the 256 KiB vreg file, so the gather/matmul does
    not spill.  No divisibility constraint: the grid uses cdiv + padded rows."""
    per_row = ow_p * (kf + cout) * 4
    return max(1, min(oh, budget_bytes // max(per_row, 1)))


def _vmem_limit_bytes(stride, hs, ws, cin, tile_oh, ow_p, cout, kf, itemsize):
    """Padded-footprint estimate (lane -> 128, sublane -> 8) of the
    double-buffered pipeline blocks; used to set the scoped-VMEM limit."""
    lane, sub = 128, 8
    img = stride * stride * hs * _round_up(ws, sub) * _round_up(cin, lane) * itemsize
    out = tile_oh * _round_up(ow_p, sub) * _round_up(cout, lane) * itemsize
    wts = _round_up(kf, sub) * _round_up(cout, lane) * 4 + sub * lane * 4
    est = 2 * (img + out + wts)
    # TODO(synk): if `img` approaches the v7x budget (64 MiB physical), switch
    # the image input to memory_space=pl.ANY and manually double-buffer a
    # (tile_oh + KH - 1)-row halo window instead of keeping it fully resident.
    return int(min(max(2 * est + (4 << 20), 32 << 20), 96 << 20))


def unit_dw_conv(x_nchw, w_dw, b_dw, w_pw, b_pw, *, stride=1, padding=0,
                 use_bf16_mxu=None):
    """Depthwise-separable conv matching PyTorch UnitDWConv.forward.

    x_nchw : (N, Cin, H, W)
    w_dw   : (Cin, 1, KH, KW)   depthwise weight (groups == Cin)
    b_dw   : (Cin,)
    w_pw   : (Cout, Cin, 1, 1)  pointwise weight
    b_pw   : (Cout,)
    returns (N, Cout, OH, OW)
    """
    N, Cin, H, W = x_nchw.shape
    Cout = int(w_pw.shape[0])
    KH, KW = int(w_dw.shape[2]), int(w_dw.shape[3])
    s = int(stride)
    OH = (H + 2 * padding - KH) // s + 1
    OW = (W + 2 * padding - KW) // s + 1
    assert OH > 0 and OW > 0, "output would be empty"

    itemsize = jnp.dtype(x_nchw.dtype).itemsize
    sub_pack = 8 * max(1, 4 // itemsize)           # sublane pack of input dtype
    OW_p = _round_up(OW, sub_pack)                 # retile-free in-kernel reshapes
    Kf = KH * KW * Cin

    if use_bf16_mxu is None:
        use_bf16_mxu = x_nchw.dtype == jnp.bfloat16
    mxu_dtype = jnp.bfloat16 if use_bf16_mxu else jnp.float32

    # ---- fused weights / bias (tiny wrapper-side precompute) ----------------
    wdw = jnp.transpose(w_dw[:, 0], (1, 2, 0)).astype(jnp.float32)      # (KH, KW, Cin)
    wpw = jnp.transpose(w_pw[:, :, 0, 0], (1, 0)).astype(jnp.float32)   # (Cin, Cout)
    wf = (wdw[:, :, :, None] * wpw[None, None, :, :]).reshape(Kf, Cout)
    bf = (b_dw.astype(jnp.float32) @ wpw + b_pw.astype(jnp.float32)).reshape(1, Cout)

    # ---- tiling / grid -------------------------------------------------------
    tile_oh = _pick_tile_oh(OH, OW_p, Kf, Cout)
    n_row_tiles = -(-OH // tile_oh)
    OH_p = n_row_tiles * tile_oh

    # ---- pad + phase-split the input so every in-kernel read is a contiguous,
    #      in-bounds slice (the phase split also absorbs the stride) ----------
    Hp = _round_up(max(H + 2 * padding, (OH_p - 1) * s + KH), s)
    Wp = _round_up(max(W + 2 * padding, (OW_p - 1) * s + KW), s)
    x = jnp.transpose(x_nchw, (0, 2, 3, 1))                              # NHWC
    x = jnp.pad(x, ((0, 0), (padding, Hp - H - padding),
                    (padding, Wp - W - padding), (0, 0)))
    Hs, Ws = Hp // s, Wp // s
    # x[n, s*i + a, s*j + b, c] -> xph[n*s*s + a*s + b, i, j, c]
    xph = x.reshape(N, Hs, s, Ws, s, Cin).transpose(0, 2, 4, 1, 3, 5)
    xph = xph.reshape(N * s * s, Hs, Ws, Cin)
    # TODO(synk): for very small Cin this layout pads the lane dim toward 128 in
    # the tiled VMEM/HBM layouts; folding W into the lane axis (Hs, Ws*Cin)
    # would remove that inflation but needs a per-tap lane->sublane regroup for
    # the im2col gather.

    kernel = functools.partial(
        _fused_dwsep_kernel,
        kh_size=KH, kw_size=KW, stride=s, tile_oh=tile_oh, ow_p=OW_p,
        cout=Cout, kf=Kf, mxu_dtype=mxu_dtype)

    vmem_limit = _vmem_limit_bytes(s, Hs, Ws, Cin, tile_oh, OW_p, Cout, Kf,
                                   itemsize)

    out = pl.pallas_call(
        kernel,
        out_shape=jax.ShapeDtypeStruct((N, OH_p, OW_p, Cout), x_nchw.dtype),
        grid_spec=pltpu.PrefetchScalarGridSpec(
            num_scalar_prefetch=0,
            grid=(N, n_row_tiles),
            in_specs=[
                # Phase-split image of one batch element: its block index only
                # depends on n, so it is DMA'd once per image and stays
                # resident in VMEM while the row tiles iterate.
                pl.BlockSpec((s * s, Hs, Ws, Cin), lambda n, r: (n, 0, 0, 0)),
                pl.BlockSpec((Kf, Cout), lambda n, r: (0, 0)),
                pl.BlockSpec((1, Cout), lambda n, r: (0, 0)),
            ],
            out_specs=pl.BlockSpec((1, tile_oh, OW_p, Cout),
                                   lambda n, r: (n, r, 0, 0)),
        ),
        compiler_params=pltpu.CompilerParams(
            # Batch axis carries megacore / 2-TC sharding so each core only
            # fetches its own images; row tiles of one image stay on one core.
            dimension_semantics=("parallel", "arbitrary"),
            vmem_limit_bytes=vmem_limit),
    )(xph, wf, bf)

    out = out[:, :OH, :OW, :]                      # drop row / col padding
    return jnp.transpose(out, (0, 3, 1, 2))        # NHWC -> NCHW


def _reference_forward(x, w_dw, b_dw, w_pw, b_pw, stride, padding):
    """Pure-JAX reference (lax.conv) mirroring nn.Conv2d semantics."""
    dw = lax.conv_general_dilated(
        x, w_dw,
        window_strides=(stride, stride),
        padding=((padding, padding), (padding, padding)),
        dimension_numbers=("NCHW", "OIHW", "NCHW"),
        feature_group_count=x.shape[1],
    ) + b_dw.reshape(1, -1, 1, 1)
    pw = lax.conv_general_dilated(
        dw, w_pw,
        window_strides=(1, 1),
        padding="VALID",
        dimension_numbers=("NCHW", "OIHW", "NCHW"),
    ) + b_pw.reshape(1, -1, 1, 1)
    return pw


def _make_params(key, cin, cout, k):
    k1, k2, k3, k4 = jax.random.split(key, 4)
    fan_dw = k * k          # depthwise: in_channels/groups * kh * kw
    fan_pw = cin            # pointwise: in_channels * 1 * 1
    w_dw = jax.random.uniform(k1, (cin, 1, k, k), jnp.float32,
                              -1.0 / fan_dw ** 0.5, 1.0 / fan_dw ** 0.5)
    b_dw = jax.random.uniform(k2, (cin,), jnp.float32,
                              -1.0 / fan_dw ** 0.5, 1.0 / fan_dw ** 0.5)
    w_pw = jax.random.uniform(k3, (cout, cin, 1, 1), jnp.float32,
                              -1.0 / fan_pw ** 0.5, 1.0 / fan_pw ** 0.5)
    b_pw = jax.random.uniform(k4, (cout,), jnp.float32,
                              -1.0 / fan_pw ** 0.5, 1.0 / fan_pw ** 0.5)
    return w_dw, b_dw, w_pw, b_pw


if __name__ == "__main__":
    key = jax.random.PRNGKey(0)
    cases = [
        # (N, Cin, H,  W,  Cout, K, stride, padding)
        (2, 4, 16, 16, 8, 3, 1, 1),    # standard 3x3, stride 1
        (2, 3, 16, 16, 6, 3, 2, 1),    # strided path (phase-split input)
    ]
    for idx, (N, Cin, H, W, Cout, K, stride, padding) in enumerate(cases):
        key, kx, kp = jax.random.split(key, 3)
        x = jax.random.normal(kx, (N, Cin, H, W), dtype=jnp.float32)
        w_dw, b_dw, w_pw, b_pw = _make_params(kp, Cin, Cout, K)

        out = unit_dw_conv(x, w_dw, b_dw, w_pw, b_pw,
                           stride=stride, padding=padding)
        out = jax.block_until_ready(out)
        ref = jax.block_until_ready(
            _reference_forward(x, w_dw, b_dw, w_pw, b_pw, stride, padding))

        assert out.shape == ref.shape, (idx, out.shape, ref.shape)
        max_err = float(jnp.max(jnp.abs(out - ref)))
        assert jnp.allclose(out, ref, atol=1e-4, rtol=1e-4), (idx, max_err)

    print("KERNEL_OK")
</pallas_src>

<mosaic_0001>
module attributes {stable_mosaic.version = 11 : i64} {
  func.func @_fused_dwsep_kernel(%arg0: i32, %arg1: i32, %arg2: memref<1x18x18x4xf32, #tpu.memory_space<vmem>>, %arg3: memref<36x8xf32, #tpu.memory_space<vmem>>, %arg4: memref<1x8xf32, #tpu.memory_space<vmem>>, %arg5: memref<1x16x16x8xf32, #tpu.memory_space<vmem>>) attributes {dimension_semantics = [#tpu.dimension_semantics<parallel>, #tpu.dimension_semantics<arbitrary>], iteration_bounds = array<i64: 2, 1>, scalar_prefetch = 0 : i64, scratch_operands = 0 : i64, tpu.core_type = #tpu.core_type<tc>, window_params = [{transform_indices = @transform_0, window_bounds = array<i64: 1, 18, 18, 4>}, {pipeline_mode = #tpu.pipeline_mode<synchronous>, transform_indices = @transform_1, window_bounds = array<i64: 36, 8>}, {pipeline_mode = #tpu.pipeline_mode<synchronous>, transform_indices = @transform_2, window_bounds = array<i64: 1, 8>}, {transform_indices = @transform_3, window_bounds = array<i64: 1, 16, 16, 8>}]} {
    %c16_i32 = arith.constant 16 : i32
    %0 = arith.muli %arg1, %c16_i32 : i32
    %1 = tpu.assume_multiple %0, 16 : i32
    %c0_i32 = arith.constant 0 : i32
    %2 = arith.addi %1, %c0_i32 : i32
    %c0 = arith.constant 0 : index
    %3 = arith.index_cast %2 : i32 to index
    %c0_0 = arith.constant 0 : index
    %c0_1 = arith.constant 0 : index
    %4 = vector.load %arg2[%c0, %3, %c0_0, %c0_1] : memref<1x18x18x4xf32, #tpu.memory_space<vmem>>, vector<1x16x16x4xf32>
    %5 = vector.shape_cast %4 : vector<1x16x16x4xf32> to vector<16x16x4xf32>
    %c0_i32_2 = arith.constant 0 : i32
    %6 = arith.addi %1, %c0_i32_2 : i32
    %c0_3 = arith.constant 0 : index
    %7 = arith.index_cast %6 : i32 to index
    %c1 = arith.constant 1 : index
    %c0_4 = arith.constant 0 : index
    %8 = vector.load %arg2[%c0_3, %7, %c1, %c0_4] : memref<1x18x18x4xf32, #tpu.memory_space<vmem>>, vector<1x16x16x4xf32>
    %9 = vector.shape_cast %8 : vector<1x16x16x4xf32> to vector<16x16x4xf32>
    %c0_i32_5 = arith.constant 0 : i32
    %10 = arith.addi %1, %c0_i32_5 : i32
    %c0_6 = arith.constant 0 : index
    %11 = arith.index_cast %10 : i32 to index
    %c2 = arith.constant 2 : index
    %c0_7 = arith.constant 0 : index
    %12 = vector.load %arg2[%c0_6, %11, %c2, %c0_7] : memref<1x18x18x4xf32, #tpu.memory_space<vmem>>, vector<1x16x16x4xf32>
    %13 = vector.shape_cast %12 : vector<1x16x16x4xf32> to vector<16x16x4xf32>
    %c1_i32 = arith.constant 1 : i32
    %14 = arith.addi %1, %c1_i32 : i32
    %c0_8 = arith.constant 0 : index
    %15 = arith.index_cast %14 : i32 to index
    %c0_9 = arith.constant 0 : index
    %c0_10 = arith.constant 0 : index
    %16 = vector.load %arg2[%c0_8, %15, %c0_9, %c0_10] : memref<1x18x18x4xf32, #tpu.memory_space<vmem>>, vector<1x16x16x4xf32>
    %17 = vector.shape_cast %16 : vector<1x16x16x4xf32> to vector<16x16x4xf32>
    %c1_i32_11 = arith.constant 1 : i32
    %18 = arith.addi %1, %c1_i32_11 : i32
    %c0_12 = arith.constant 0 : index
    %19 = arith.index_cast %18 : i32 to index
    %c1_13 = arith.constant 1 : index
    %c0_14 = arith.constant 0 : index
    %20 = vector.load %arg2[%c0_12, %19, %c1_13, %c0_14] : memref<1x18x18x4xf32, #tpu.memory_space<vmem>>, vector<1x16x16x4xf32>
    %21 = vector.shape_cast %20 : vector<1x16x16x4xf32> to vector<16x16x4xf32>
    %c1_i32_15 = arith.constant 1 : i32
    %22 = arith.addi %1, %c1_i32_15 : i32
    %c0_16 = arith.constant 0 : index
    %23 = arith.index_cast %22 : i32 to index
    %c2_17 = arith.constant 2 : index
    %c0_18 = arith.constant 0 : index
    %24 = vector.load %arg2[%c0_16, %23, %c2_17, %c0_18] : memref<1x18x18x4xf32, #tpu.memory_space<vmem>>, vector<1x16x16x4xf32>
    %25 = vector.shape_cast %24 : vector<1x16x16x4xf32> to vector<16x16x4xf32>
    %c2_i32 = arith.constant 2 : i32
    %26 = arith.addi %1, %c2_i32 : i32
    %c0_19 = arith.constant 0 : index
    %27 = arith.index_cast %26 : i32 to index
    %c0_20 = arith.constant 0 : index
    %c0_21 = arith.constant 0 : index
    %28 = vector.load %arg2[%c0_19, %27, %c0_20, %c0_21] : memref<1x18x18x4xf32, #tpu.memory_space<vmem>>, vector<1x16x16x4xf32>
    %29 = vector.shape_cast %28 : vector<1x16x16x4xf32> to vector<16x16x4xf32>
    %c2_i32_22 = arith.constant 2 : i32
    %30 = arith.addi %1, %c2_i32_22 : i32
    %c0_23 = arith.constant 0 : index
    %31 = arith.index_cast %30 : i32 to index
    %c1_24 = arith.constant 1 : index
    %c0_25 = arith.constant 0 : index
    %32 = vector.load %arg2[%c0_23, %31, %c1_24, %c0_25] : memref<1x18x18x4xf32, #tpu.memory_space<vmem>>, vector<1x16x16x4xf32>
    %33 = vector.shape_cast %32 : vector<1x16x16x4xf32> to vector<16x16x4xf32>
    %c2_i32_26 = arith.constant 2 : i32
    %34 = arith.addi %1, %c2_i32_26 : i32
    %c0_27 = arith.constant 0 : index
    %35 = arith.index_cast %34 : i32 to index
    %c2_28 = arith.constant 2 : index
    %c0_29 = arith.constant 0 : index
    %36 = vector.load %arg2[%c0_27, %35, %c2_28, %c0_29] : memref<1x18x18x4xf32, #tpu.memory_space<vmem>>, vector<1x16x16x4xf32>
    %37 = vector.shape_cast %36 : vector<1x16x16x4xf32> to vector<16x16x4xf32>
    %38 = tpu.concatenate %5, %9, %13, %17, %21, %25, %29, %33, %37 in 2 : vector<16x16x4xf32>, vector<16x16x4xf32>, vector<16x16x4xf32>, vector<16x16x4xf32>, vector<16x16x4xf32>, vector<16x16x4xf32>, vector<16x16x4xf32>, vector<16x16x4xf32>, vector<16x16x4xf32> -> vector<16x16x36xf32>
    %39 = vector.shape_cast %38 : vector<16x16x36xf32> to vector<256x36xf32>
    %c0_30 = arith.constant 0 : index
    %c0_31 = arith.constant 0 : index
    %40 = vector.load %arg3[%c0_30, %c0_31] : memref<36x8xf32, #tpu.memory_space<vmem>>, vector<36x8xf32>
    %cst = arith.constant dense<0.000000e+00> : vector<256x8xf32>
    %41 = tpu.matmul %39, %40, %cst {dimension_numbers = #tpu.dot_dimension_numbers<[1], [0], [0], [1], [0, 0, 1, 1], [], []>} : vector<256x36xf32>, vector<36x8xf32>, vector<256x8xf32> -> vector<256x8xf32>
    %c0_32 = arith.constant 0 : index
    %c0_33 = arith.constant 0 : index
    %42 = vector.load %arg4[%c0_32, %c0_33] : memref<1x8xf32, #tpu.memory_space<vmem>>, vector<1x8xf32>
    %43 = vector.broadcast %42 : vector<1x8xf32> to vector<256x8xf32>
    %44 = arith.addf %41, %43 : vector<256x8xf32>
    %45 = vector.shape_cast %44 : vector<256x8xf32> to vector<16x16x8xf32>
    %c0_34 = arith.constant 0 : index
    %c0_35 = arith.constant 0 : index
    %c0_36 = arith.constant 0 : index
    %c0_37 = arith.constant 0 : index
    %46 = vector.load %arg5[%c0_34, %c0_35, %c0_36, %c0_37] : memref<1x16x16x8xf32, #tpu.memory_space<vmem>>, vector<1x16x16x8xf32>
    %47 = vector.shape_cast %46 : vector<1x16x16x8xf32> to vector<16x16x8xf32>
    %48 = vector.shape_cast %45 : vector<16x16x8xf32> to vector<1x16x16x8xf32>
    tpu.vector_store %arg5[%c0_34, %c0_35, %c0_36, %c0_37], %48 {strides = array<i32>} : memref<1x16x16x8xf32, #tpu.memory_space<vmem>>, vector<1x16x16x8xf32>,
    return
  }
  func.func @transform_0(%arg0: i32, %arg1: i32) -> (i32, i32, i32, i32) {
    %c0_i32 = arith.constant 0 : i32
    %c0_i32_0 = arith.constant 0 : i32
    %c0_i32_1 = arith.constant 0 : i32
    %c0_i32_2 = arith.constant 0 : i32
    return %arg0, %c0_i32, %c0_i32_0, %c0_i32_1 : i32, i32, i32, i32
  }
  func.func @transform_1(%arg0: i32, %arg1: i32) -> (i32, i32) {
    %c0_i32 = arith.constant 0 : i32
    %c0_i32_0 = arith.constant 0 : i32
    %c0_i32_1 = arith.constant 0 : i32
    return %c0_i32, %c0_i32_0 : i32, i32
  }
  func.func @transform_2(%arg0: i32, %arg1: i32) -> (i32, i32) {
    %c0_i32 = arith.constant 0 : i32
    %c0_i32_0 = arith.constant 0 : i32
    %c0_i32_1 = arith.constant 0 : i32
    return %c0_i32, %c0_i32_0 : i32, i32
  }
  func.func @transform_3(%arg0: i32, %arg1: i32) -> (i32, i32, i32, i32) {
    %c0_i32 = arith.constant 0 : i32
    %c0_i32_0 = arith.constant 0 : i32
    %c0_i32_1 = arith.constant 0 : i32
    return %arg0, %arg1, %c0_i32, %c0_i32_0 : i32, i32, i32, i32
  }
}

</mosaic_0001>

<bundles_post_ra>
// kernel: tpu_custom_call.1
= control target key start
LH: loop header
LB: loop body
LE: loop exit
PB: predicated region body
PF: predicated region fallthrough
CT: control target
= control target key end

     0   :  { %s2679_s12 = smov 0   ;;  %s2681_s13 = smov 0   ;;  %s4177_s0 = inlined_call_operand.vmem [shape: f32[2,18,18,4], index: 0, kind: input, shape index: {}]   ;;  %s4178_s1 = inlined_call_operand.vmem [shape: f32[36,8], index: 1, kind: input, shape index: {}]   ;;  %s4179_s2 = inlined_call_operand.vmem [shape: f32[1,8], index: 2, kind: input, shape index: {}]   ;;  %s4180_s3 = inlined_call_operand.vmem [shape: f32[2,16,16,8], index: 3, kind: output, shape index: {}]  }
   0x1   :  { %s2683_s14 = smov 0  }
   0x2 LB: > { %s25_s15 = sadd.s32 1, %s2645_s13  ;;  %p2252_p0 = scmp.ge.s32.totalorder %s2649_s14, 1  ;;  %s2649_s14 = sphi %s2683_s14, %s13_s14   ;;  %s2645_s13 = sphi %s2681_s13, %s4330_s13   ;;  %s2641_s12 = sphi %s2679_s12, %s4329_s12  }
   0x3   : > { %p27_p1 = scmp.ge.s32.totalorder %s25_s15, 2  ;;  %p151_p2 = scmp.lt.s32.totalorder %s2649_s14, 3 }
   0x5   : > { %s4332_s15 = smov (%p27_p1, %s25_s15), 0  ;;  %p152_p3 = pnand %p2252_p0, %p151_p2 }
   0x7   : > { %155 = sbr.rel (%p152_p3) target bundleno = 861 (0x35d), region = 32 }
   0xe   : > { %p180_p4 = scmp.lt.s32.totalorder %s2641_s12, 1  ;;  %s2651_s20 = smov 4   ;;  %vm1517_vm0 = vcmask 31744   ;;  %vm1890_vm1 = vcmask 1043456   ;;  %vm1550_vm2 = vcmask 64512   ;;  %vm1583_vm3 = vcmask 97280  }
   0xf   : > { %s2652_s21 = smov 8   ;;  %s2653_s22 = smov 12   ;;  %vm1616_vm4 = vcmask 130048   ;;  %vm1649_vm5 = vcmask 162816   ;;  %vm1682_vm6 = vcmask 195584   ;;  %vm1715_vm7 = vcmask 228352  }
  0x10   : > { %s4334_s12 = smov (!%p180_p4, %s2641_s12), 1  ;;  %s2654_s23 = smov 16   ;;  %vm1748_vm8 = vcmask 261120   ;;  %vm1793_vm9 = vcmask 293888  }
  0x11   : > { %s2594_s16 = smul.u32 432, %s4334_s12  ;;  %s2655_s24 = smov 20  }
  0x12   : > { %s2656_s25 = smov 24   ;;  %s2657_s30 = smov 28  }
  0x13   : > { %s2703_s19 = scalar_lea.vmem %s4177_s0, %s2594_s16  ;;  %s2658_s10 = smov 32  }
  0x14   : > { %v2706_v0 = vld [vmem:[%s2703_s19 + $0x19] sm:$0xff]  ;;  %v231_v1 = vld [vmem:[%s2703_s19 + $0x1] sm:$0xff]  ;;  %v232_v3 = vld [vmem:[%s2703_s19 + $0x9] sm:$0xff]  ;;  %s2484_s11 = sshll.u32 %s4334_s12, 8 }
  0x15   : > { %529 = vrot.lane.b32.xlu1 %v2706_v0, %s2651_s20  ;;  %525 = vrot.lane.b32.xlu0 %v231_v1, %s2651_s20  ;;  %v2713_v2 = vld [vmem:[%s2703_s19 + $0x21] sm:$0xff]  ;;  %v2720_v4 = vld [vmem:[%s2703_s19 + $0x39] sm:$0xff] }
  0x16   : > { %v2723_v5 = vld [vmem:[%s2703_s19 + $0x31] sm:$0xff]  ;;  %v2733_v7 = vld [vmem:[%s2703_s19 + $0x49] sm:$0xff]  ;;  %v2741_v9 = vld [vmem:[%s2703_s19 + $0x61] sm:$0xff] }
  0x17   : > { %v2730_v6 = vld [vmem:[%s2703_s19 + $0x51] sm:$0xff]  ;;  %v240_v8 = vld [vmem:[%s2703_s19 + $0x69] sm:$0xff]  ;;  %4215 = vst [vmem:[#allocation2_spill] sm:$0xff] %v2741_v9  ;;  %v242_v10 = vld [vmem:[%s2703_s19 + $0x81] sm:$0xff] }
  0x18   : > { %v241_v11 = vld [vmem:[%s2703_s19 + $0x79] sm:$0xff]  ;;  %v243_v13 = vld [vmem:[%s2703_s19 + $0x91] sm:$0xff]  ;;  %v245_v15 = vld [vmem:[%s2703_s19 + $0xa9] sm:$0xff] }
  0x19   : > { %531 = vrot.lane.b32.xlu1 %v2713_v2, %s2651_s20  ;;  %527 = vrot.lane.b32.xlu0 %v232_v3, %s2651_s20  ;;  %v244_v12 = vld [vmem:[%s2703_s19 + $0x99] sm:$0xff]  ;;  %v246_v14 = vld [vmem:[%s2703_s19 + $0xb1] sm:$0xff] }
  0x1a   : > { %v248_v16 = vld [vmem:[%s2703_s19 + $0xc9] sm:$0xff]  ;;  %v247_v17 = vld [vmem:[%s2703_s19 + $0xc1] sm:$0xff]  ;;  %v2766_v19 = vld [vmem:[%s2703_s19 + $0xd9] sm:$0xff] }
  0x1b   : > { %v2763_v18 = vld [vmem:[%s2703_s19 + $0xe1] sm:$0xff]  ;;  %v2773_v20 = vld [vmem:[%s2703_s19 + $0xf9] sm:$0xff]  ;;  %v2776_v21 = vld [vmem:[%s2703_s19 + $0xf1] sm:$0xff] }
  0x1c   : > { %v2783_v22 = vld [vmem:[%s2703_s19 + $0x111] sm:$0xff]  ;;  %v2786_v23 = vld [vmem:[%s2703_s19 + $0x109] sm:$0xff]  ;;  %v2796_v25 = vld [vmem:[%s2703_s19 + $0x121] sm:$0xff] }
  0x1d   : > { %535 = vrot.lane.b32.xlu1 %v2720_v4, %s2651_s20  ;;  %533 = vrot.lane.b32.xlu0 %v2723_v5, %s2651_s20  ;;  %v2793_v24 = vld [vmem:[%s2703_s19 + $0x129] sm:$0xff]  ;;  %4217 = vst [vmem:[#allocation4_spill] sm:$0xff] %v2796_v25  ;;  %v258_v26 = vld [vmem:[%s2703_s19 + $0x141] sm:$0xff] }
  0x1e   : > { %4216 = vst [vmem:[#allocation3_spill] sm:$0xff] %v2793_v24  ;;  %v257_v27 = vld [vmem:[%s2703_s19 + $0x139] sm:$0xff]  ;;  %v259_v29 = vld [vmem:[%s2703_s19 + $0x151] sm:$0xff]  ;;  %v261_v31 = vld [vmem:[%s2703_s19 + $0x169] sm:$0xff] }
  0x1f   : > { %v260_v28 = vld [vmem:[%s2703_s19 + $0x159] sm:$0xff]  ;;  %v262_v30 = vld [vmem:[%s2703_s19 + $0x171] sm:$0xff]  ;;  %v263_v33 = vld [vmem:[%s2703_s19 + $0x2] sm:$0xff] }
  0x20   : > { %v264_v32 = vld [vmem:[%s2703_s19 + $0xa] sm:$0xff]  ;;  %v2819_v34 = vld [vmem:[%s2703_s19 + $0x22] sm:$0xff]  ;;  %v2822_v35 = vld [vmem:[%s2703_s19 + $0x1a] sm:$0xff] }
  0x21   : > { %539 = vrot.lane.b32.xlu1 %v2730_v6, %s2651_s20  ;;  %537 = vrot.lane.b32.xlu0 %v2733_v7, %s2651_s20  ;;  %v2829_v36 = vld [vmem:[%s2703_s19 + $0x3a] sm:$0xff]  ;;  %v2832_v37 = vld [vmem:[%s2703_s19 + $0x32] sm:$0xff] }
  0x22   : > { %v2839_v38 = vld [vmem:[%s2703_s19 + $0x52] sm:$0xff]  ;;  %v2842_v39 = vld [vmem:[%s2703_s19 + $0x4a] sm:$0xff]  ;;  %v2852_v41 = vld [vmem:[%s2703_s19 + $0x62] sm:$0xff] }
  0x23   : > { %v2849_v40 = vld [vmem:[%s2703_s19 + $0x6a] sm:$0xff]  ;;  %4219 = vst [vmem:[#allocation6_spill] sm:$0xff] %v2852_v41  ;;  %v274_v42 = vld [vmem:[%s2703_s19 + $0x82] sm:$0xff]  ;;  %v273_v43 = vld [vmem:[%s2703_s19 + $0x7a] sm:$0xff] }
  0x24   : > { %4218 = vst [vmem:[#allocation5_spill] sm:$0xff] %v2849_v40  ;;  %v276_v44 = vld [vmem:[%s2703_s19 + $0x9a] sm:$0xff]  ;;  %v275_v45 = vld [vmem:[%s2703_s19 + $0x92] sm:$0xff]  ;;  %v277_v47 = vld [vmem:[%s2703_s19 + $0xaa] sm:$0xff] }
  0x25   : > { %543 = vrot.lane.b32.xlu1 %v240_v8, %s2651_s20  ;;  %541 = vrot.lane.b32.xlu0 %v2741_v9, %s2651_s20  ;;  %v278_v46 = vld [vmem:[%s2703_s19 + $0xb2] sm:$0xff]  ;;  %v280_v48 = vld [vmem:[%s2703_s19 + $0xca] sm:$0xff] }
  0x26   : > { %v279_v49 = vld [vmem:[%s2703_s19 + $0xc2] sm:$0xff]  ;;  %v2878_v51 = vld [vmem:[%s2703_s19 + $0xda] sm:$0xff]  ;;  %v2888_v53 = vld [vmem:[%s2703_s19 + $0xf2] sm:$0xff] }
  0x27   : > { %v2875_v50 = vld [vmem:[%s2703_s19 + $0xe2] sm:$0xff]  ;;  %v2885_v52 = vld [vmem:[%s2703_s19 + $0xfa] sm:$0xff]  ;;  %v2895_v54 = vld [vmem:[%s2703_s19 + $0x112] sm:$0xff] }
  0x28   : > { %v2898_v55 = vld [vmem:[%s2703_s19 + $0x10a] sm:$0xff]  ;;  %v2908_v57 = vld [vmem:[%s2703_s19 + $0x122] sm:$0xff]  ;;  %v2916_v59 = vld [vmem:[%s2703_s19 + $0x13a] sm:$0xff] }
  0x29   : > { %547 = vrot.lane.b32.xlu1 %v242_v10, %s2651_s20  ;;  %545 = vrot.lane.b32.xlu0 %v241_v11, %s2651_s20  ;;  %v2905_v56 = vld [vmem:[%s2703_s19 + $0x12a] sm:$0xff]  ;;  %4221 = vst [vmem:[#allocation8_spill] sm:$0xff] %v2908_v57  ;;  %v290_v58 = vld [vmem:[%s2703_s19 + $0x142] sm:$0xff]  ;;  %4222 = vst [vmem:[#allocation9_spill] sm:$0xff] %v2916_v59 }
  0x2a   : > { %4220 = vst [vmem:[#allocation7_spill] sm:$0xff] %v2905_v56  ;;  %v292_v62 = vld [vmem:[%s2703_s19 + $0x15a] sm:$0xff]  ;;  %v291_v63 = vld [vmem:[%s2703_s19 + $0x152] sm:$0xff]  ;;  %v293_v10 = vld [vmem:[%s2703_s19 + $0x16a] sm:$0xff] }
  0x2b   : > { %v294_v8 = vld [vmem:[%s2703_s19 + $0x172] sm:$0xff] }
  0x2d   : > { %551 = vrot.lane.b32.xlu1 %v244_v12, %s2651_s20  ;;  %549 = vrot.lane.b32.xlu0 %v243_v13, %s2651_s20 }
  0x31   : > { %555 = vrot.lane.b32.xlu1 %v246_v14, %s2651_s20  ;;  %553 = vrot.lane.b32.xlu0 %v245_v15, %s2651_s20  ;;  %v2946_v15 = vld [vmem:[%s2703_s19 + $0x18] sm:$0xff] }
  0x32   : > { %4227 = vst [vmem:[#allocation14_spill] sm:$0xff] %v2946_v15 }
  0x35   : > { %559 = vrot.lane.b32.xlu1 %v248_v16, %s2651_s20  ;;  %557 = vrot.lane.b32.xlu0 %v247_v17, %s2651_s20  ;;  %v2949_v16 = vld [vmem:[%s2703_s19 + $0x20] sm:$0xff] }
  0x36   : > { %4228 = vst [vmem:[#allocation15_spill] sm:$0xff] %v2949_v16 }
  0x39   : > { %563 = vrot.lane.b32.xlu1 %v2763_v18, %s2651_s20  ;;  %561 = vrot.lane.b32.xlu0 %v2766_v19, %s2651_s20 }
  0x3d   : > { %567 = vrot.lane.b32.xlu1 %v2773_v20, %s2651_s20  ;;  %565 = vrot.lane.b32.xlu0 %v2776_v21, %s2651_s20 }
  0x41   : > { %571 = vrot.lane.b32.xlu1 %v2783_v22, %s2651_s20  ;;  %569 = vrot.lane.b32.xlu0 %v2786_v23, %s2651_s20 }
  0x45   : > { %575 = vrot.lane.b32.xlu1 %v2793_v24, %s2651_s20  ;;  %573 = vrot.lane.b32.xlu0 %v2796_v25, %s2651_s20 }
  0x49   : > { %579 = vrot.lane.b32.xlu1 %v258_v26, %s2651_s20  ;;  %577 = vrot.lane.b32.xlu0 %v257_v27, %s2651_s20  ;;  %v2960_v27 = vld [vmem:[%s2703_s19 + $0x38] sm:$0xff] }
  0x4d   : > { %583 = vrot.lane.b32.xlu1 %v260_v28, %s2651_s20  ;;  %581 = vrot.lane.b32.xlu0 %v259_v29, %s2651_s20  ;;  %v2963_v28 = vld [vmem:[%s2703_s19 + $0x30] sm:$0xff] }
  0x51   : > { %587 = vrot.lane.b32.xlu1 %v262_v30, %s2651_s20  ;;  %585 = vrot.lane.b32.xlu0 %v261_v31, %s2651_s20  ;;  %v2974_v31 = vld [vmem:[%s2703_s19 + $0x50] sm:$0xff]  ;;  %s4006_s20 = scalar_lea.vmem %s4180_s3, %s2484_s11 }
  0x55   : > { %655 = vrot.lane.b32.xlu1 %v264_v32, %s2652_s21  ;;  %653 = vrot.lane.b32.xlu0 %v263_v33, %s2652_s21  ;;  %v2977_v32 = vld [vmem:[%s2703_s19 + $0x48] sm:$0xff]  ;;  %v212_v33 = vld [vmem:[%s2703_s19 + $0x98] sm:$0xff] }
  0x59   : > { %659 = vrot.lane.b32.xlu1 %v2819_v34, %s2652_s21  ;;  %657 = vrot.lane.b32.xlu0 %v2822_v35, %s2652_s21 }
  0x5d   : > { %663 = vrot.lane.b32.xlu1 %v2829_v36, %s2652_s21  ;;  %661 = vrot.lane.b32.xlu0 %v2832_v37, %s2652_s21 }
  0x61   : > { %667 = vrot.lane.b32.xlu1 %v2839_v38, %s2652_s21  ;;  %665 = vrot.lane.b32.xlu0 %v2842_v39, %s2652_s21 }
  0x65   : > { %671 = vrot.lane.b32.xlu1 %v2849_v40, %s2652_s21  ;;  %669 = vrot.lane.b32.xlu0 %v2852_v41, %s2652_s21  ;;  %v3095_v41 = vld [vmem:[%s2703_s19 + $0x120] sm:$0xff] }
  0x66   : > { %4245 = vst [vmem:[#allocation32_spill] sm:$0xff] %v3095_v41 }
  0x69   : > { %675 = vrot.lane.b32.xlu1 %v274_v42, %s2652_s21  ;;  %673 = vrot.lane.b32.xlu0 %v273_v43, %s2652_s21  ;;  %v211_v42 = vld [vmem:[%s2703_s19 + $0x90] sm:$0xff] }
  0x6d   : > { %679 = vrot.lane.b32.xlu1 %v276_v44, %s2652_s21  ;;  %677 = vrot.lane.b32.xlu0 %v275_v45, %s2652_s21  ;;  %v2986_v45 = vld [vmem:[%s2703_s19 + $0x68] sm:$0xff] }
  0x71   : > { %683 = vrot.lane.b32.xlu1 %v278_v46, %s2652_s21  ;;  %681 = vrot.lane.b32.xlu0 %v277_v47, %s2652_s21  ;;  %v2989_v46 = vld [vmem:[%s2703_s19 + $0x60] sm:$0xff] }
  0x75   : > { %687 = vrot.lane.b32.xlu1 %v280_v48, %s2652_s21  ;;  %685 = vrot.lane.b32.xlu0 %v279_v49, %s2652_s21  ;;  %v214_v49 = vld [vmem:[%s2703_s19 + $0xb0] sm:$0xff] }
  0x79   : > { %691 = vrot.lane.b32.xlu1 %v2875_v50, %s2652_s21  ;;  %689 = vrot.lane.b32.xlu0 %v2878_v51, %s2652_s21 }
  0x7d   : > { %695 = vrot.lane.b32.xlu1 %v2885_v52, %s2652_s21  ;;  %693 = vrot.lane.b32.xlu0 %v2888_v53, %s2652_s21 }
  0x81   : > { %699 = vrot.lane.b32.xlu1 %v2895_v54, %s2652_s21  ;;  %697 = vrot.lane.b32.xlu0 %v2898_v55, %s2652_s21 }
  0x85   : > { %703 = vrot.lane.b32.xlu1 %v2905_v56, %s2652_s21  ;;  %701 = vrot.lane.b32.xlu0 %v2908_v57, %s2652_s21  ;;  %v3092_v56 = vld [vmem:[%s2703_s19 + $0x128] sm:$0xff]  ;;  %v230_v57 = vld [vmem:[%s2703_s19 + $0x170] sm:$0xff] }
  0x86   : > { %4244 = vst [vmem:[#allocation31_spill] sm:$0xff] %v3092_v56 }
  0x87   : > { %v2918_v60 = vpop.permute.xlu1 %529  ;;  %v2920_v61 = vpop.permute.xlu0 %525 }
  0x88   : > { %4223 = vst [vmem:[#allocation10_spill] sm:$0xff] %v2918_v60  ;;  %4224 = vst [vmem:[#allocation11_spill] sm:$0xff] %v2920_v61 }
  0x89   : > { %707 = vrot.lane.b32.xlu1 %v290_v58, %s2652_s21  ;;  %705 = vrot.lane.b32.xlu0 %v2916_v59, %s2652_s21  ;;  %v213_v58 = vld [vmem:[%s2703_s19 + $0xa8] sm:$0xff]  ;;  %v3067_v59 = vld [vmem:[%s2703_s19 + $0xf0] sm:$0xff] }
  0x8b   : > { %v2927_v1 = vpop.permute.xlu1 %531  ;;  %v2929_v3 = vpop.permute.xlu0 %527 }
  0x8c   : > { %4225 = vst [vmem:[#allocation12_spill] sm:$0xff] %v2927_v1  ;;  %4226 = vst [vmem:[#allocation13_spill] sm:$0xff] %v2929_v3  ;;  %v3039_v3 = vld [vmem:[%s2703_s19 + $0xc0] sm:$0xff] }
  0x8d   : > { %711 = vrot.lane.b32.xlu1 %v292_v62, %s2652_s21  ;;  %709 = vrot.lane.b32.xlu0 %v291_v63, %s2652_s21  ;;  %4234 = vst [vmem:[#allocation21_spill] sm:$0xff] %v3039_v3 }
  0x8f   : > { %v2935_v11 = vpop.permute.xlu1 %535  ;;  %v2937_v12 = vpop.permute.xlu0 %533 }
  0x91   : > { %715 = vrot.lane.b32.xlu1 %v294_v8, %s2652_s21  ;;  %713 = vrot.lane.b32.xlu0 %v293_v10, %s2652_s21  ;;  %v3004_v8 = vld [vmem:[%s2703_s19 + $0x80] sm:$0xff]  ;;  %v3007_v10 = vld [vmem:[%s2703_s19 + $0x78] sm:$0xff] }
  0x93   : > { %v2941_v13 = vpop.permute.xlu1 %539  ;;  %v2943_v14 = vpop.permute.xlu0 %537 }
  0x95   : > { %783 = vrot.lane.b32.xlu1 %v2949_v16, %s2653_s22  ;;  %781 = vrot.lane.b32.xlu0 %v2946_v15, %s2653_s22 }
  0x97   : > { %v2955_v17 = vpop.permute.xlu1 %543  ;;  %v2957_v26 = vpop.permute.xlu0 %541 }
  0x99   : > { %787 = vrot.lane.b32.xlu1 %v2960_v27, %s2653_s22  ;;  %785 = vrot.lane.b32.xlu0 %v2963_v28, %s2653_s22 }
  0x9b   : > { %v2969_v29 = vpop.permute.xlu1 %547  ;;  %v2971_v30 = vpop.permute.xlu0 %545 }
  0x9d   : > { %791 = vrot.lane.b32.xlu1 %v2974_v31, %s2653_s22  ;;  %789 = vrot.lane.b32.xlu0 %v2977_v32, %s2653_s22 }
  0x9f   : > { %v552_v43 = vpop.permute.xlu1 %551  ;;  %v550_v44 = vpop.permute.xlu0 %549 }
  0xa0   : > { %v2992_v47 = vsel %vm1517_vm0, %v212_v33, %v552_v43  ;;  %v2995_v48 = vsel %vm1517_vm0, %v211_v42, %v550_v44 }
  0xa1   : > { %795 = vrot.lane.b32.xlu1 %v2986_v45, %s2653_s22  ;;  %793 = vrot.lane.b32.xlu0 %v2989_v46, %s2653_s22 }
  0xa3   : > { %v556_v62 = vpop.permute.xlu1 %555  ;;  %v554_v63 = vpop.permute.xlu0 %553 }
  0xa4   : > { %v3010_v43 = vsel %vm1517_vm0, %v214_v49, %v556_v62  ;;  %v3013_v44 = vsel %vm1517_vm0, %v213_v58, %v554_v63 }
  0xa5   : > { %799 = vrot.lane.b32.xlu1 %v3004_v8, %s2653_s22  ;;  %797 = vrot.lane.b32.xlu0 %v3007_v10, %s2653_s22 }
  0xa7   : > { %v3019_v16 = vpop.permute.xlu1 %559  ;;  %v3021_v1 = vpop.permute.xlu0 %557 }
  0xa8   : > { %4229 = vst [vmem:[#allocation16_spill] sm:$0xff] %v3019_v16  ;;  %4230 = vst [vmem:[#allocation17_spill] sm:$0xff] %v3021_v1  ;;  %v3036_v16 = vld [vmem:[%s2703_s19 + $0xc8] sm:$0xff] }
  0xa9   : > { %803 = vrot.lane.b32.xlu1 %v212_v33, %s2653_s22  ;;  %801 = vrot.lane.b32.xlu0 %v211_v42, %s2653_s22  ;;  %4233 = vst [vmem:[#allocation20_spill] sm:$0xff] %v3036_v16  ;;  %v3081_v1 = vld [vmem:[%s2703_s19 + $0x108] sm:$0xff] }
  0xab   : > { %v3025_v62 = vpop.permute.xlu1 %563  ;;  %v3027_v63 = vpop.permute.xlu0 %561 }
  0xac   : > { %4231 = vst [vmem:[#allocation18_spill] sm:$0xff] %v3025_v62  ;;  %4232 = vst [vmem:[#allocation19_spill] sm:$0xff] %v3027_v63 }
  0xad   : > { %807 = vrot.lane.b32.xlu1 %v214_v49, %s2653_s22  ;;  %805 = vrot.lane.b32.xlu0 %v213_v58, %s2653_s22  ;;  %v3050_v49 = vld [vmem:[%s2703_s19 + $0xe0] sm:$0xff]  ;;  %v3053_v58 = vld [vmem:[%s2703_s19 + $0xd8] sm:$0xff] }
  0xae   : > { %4236 = vst [vmem:[#allocation23_spill] sm:$0xff] %v3050_v49  ;;  %4237 = vst [vmem:[#allocation24_spill] sm:$0xff] %v3053_v58 }
  0xaf   : > { %v3031_v15 = vpop.permute.xlu1 %567  ;;  %v3033_v60 = vpop.permute.xlu0 %565 }
  0xb1   : > { %811 = vrot.lane.b32.xlu1 %v3036_v16, %s2653_s22  ;;  %809 = vrot.lane.b32.xlu0 %v3039_v3, %s2653_s22  ;;  %v3064_v16 = vld [vmem:[%s2703_s19 + $0xf8] sm:$0xff]  ;;  %v3078_v3 = vld [vmem:[%s2703_s19 + $0x110] sm:$0xff] }
  0xb3   : > { %v3045_v33 = vpop.permute.xlu1 %571  ;;  %v3047_v42 = vpop.permute.xlu0 %569 }
  0xb4   : > { %4235 = vst [vmem:[#allocation22_spill] sm:$0xff] %v3047_v42 }
  0xb5   : > { %815 = vrot.lane.b32.xlu1 %v3050_v49, %s2653_s22  ;;  %813 = vrot.lane.b32.xlu0 %v3053_v58, %s2653_s22 }
  0xb7   : > { %v3059_v62 = vpop.permute.xlu1 %575  ;;  %v3061_v63 = vpop.permute.xlu0 %573 }
  0xb8   : > { %4238 = vst [vmem:[#allocation25_spill] sm:$0xff] %v3059_v62  ;;  %4239 = vst [vmem:[#allocation26_spill] sm:$0xff] %v3061_v63  ;;  %v3125_v63 = vld [vmem:[%s2703_s19 + $0x150] sm:$0xff] }
  0xb9   : > { %819 = vrot.lane.b32.xlu1 %v3064_v16, %s2653_s22  ;;  %817 = vrot.lane.b32.xlu0 %v3067_v59, %s2653_s22  ;;  %4253 = vst [vmem:[#allocation40_spill] sm:$0xff] %v3125_v63 }
  0xbb   : > { %v3073_v49 = vpop.permute.xlu1 %579  ;;  %v3075_v58 = vpop.permute.xlu0 %577 }
  0xbc   : > { %4240 = vst [vmem:[#allocation27_spill] sm:$0xff] %v3073_v49  ;;  %4241 = vst [vmem:[#allocation28_spill] sm:$0xff] %v3075_v58 }
  0xbd   : > { %823 = vrot.lane.b32.xlu1 %v3078_v3, %s2653_s22  ;;  %821 = vrot.lane.b32.xlu0 %v3081_v1, %s2653_s22 }
  0xbf   : > { %v3087_v61 = vpop.permute.xlu1 %583  ;;  %v3089_v40 = vpop.permute.xlu0 %581 }
  0xc0   : > { %4242 = vst [vmem:[#allocation29_spill] sm:$0xff] %v3087_v61  ;;  %4243 = vst [vmem:[#allocation30_spill] sm:$0xff] %v3089_v40  ;;  %v3105_v61 = vld [vmem:[%s2703_s19 + $0x140] sm:$0xff]  ;;  %v3108_v40 = vld [vmem:[%s2703_s19 + $0x138] sm:$0xff] }
  0xc1   : > { %827 = vrot.lane.b32.xlu1 %v3092_v56, %s2653_s22  ;;  %825 = vrot.lane.b32.xlu0 %v3095_v41, %s2653_s22  ;;  %4247 = vst [vmem:[#allocation34_spill] sm:$0xff] %v3105_v61  ;;  %4248 = vst [vmem:[#allocation35_spill] sm:$0xff] %v3108_v40 }
  0xc3   : > { %v588_v24 = vpop.permute.xlu1 %587  ;;  %v3102_v25 = vpop.permute.xlu0 %585 }
  0xc4   : > { %4246 = vst [vmem:[#allocation33_spill] sm:$0xff] %v3102_v25  ;;  %v3111_v58 = vsel %vm1517_vm0, %v230_v57, %v588_v24  ;;  %v3122_v25 = vld [vmem:[%s2703_s19 + $0x158] sm:$0xff] }
  0xc5   : > { %4249 = vst [vmem:[#allocation36_spill] sm:$0xff] %v3111_v58  ;;  %831 = vrot.lane.b32.xlu1 %v3105_v61, %s2653_s22  ;;  %829 = vrot.lane.b32.xlu0 %v3108_v40, %s2653_s22  ;;  %4252 = vst [vmem:[#allocation39_spill] sm:$0xff] %v3122_v25  ;;  %v3136_v61 = vld [vmem:[%s2703_s19 + $0x168] sm:$0xff] }
  0xc6   : > { %4256 = vst [vmem:[#allocation43_spill] sm:$0xff] %v3136_v61 }
  0xc7   : > { %v3117_v49 = vpop.permute.xlu1 %655  ;;  %v3119_v41 = vpop.permute.xlu0 %653 }
  0xc8   : > { %4250 = vst [vmem:[#allocation37_spill] sm:$0xff] %v3117_v49  ;;  %4251 = vst [vmem:[#allocation38_spill] sm:$0xff] %v3119_v41  ;;  %v2287_v49 = vld [vmem:[%s2703_s19 + $0x188] sm:$0xff]  ;;  %v2286_v41 = vld [vmem:[%s2703_s19 + $0x180] sm:$0xff] }
  0xc9   : > { %835 = vrot.lane.b32.xlu1 %v3122_v25, %s2653_s22  ;;  %833 = vrot.lane.b32.xlu0 %v3125_v63, %s2653_s22 }
  0xcb   : > { %v3131_v24 = vpop.permute.xlu1 %659  ;;  %v3133_v58 = vpop.permute.xlu0 %657 }
  0xcc   : > { %4254 = vst [vmem:[#allocation41_spill] sm:$0xff] %v3131_v24  ;;  %4255 = vst [vmem:[#allocation42_spill] sm:$0xff] %v3133_v58 }
  0xcd   : > { %839 = vrot.lane.b32.xlu1 %v230_v57, %s2653_s22  ;;  %837 = vrot.lane.b32.xlu0 %v3136_v61, %s2653_s22 }
  0xcf   : > { %v3143_v40 = vpop.permute.xlu1 %663  ;;  %v3145_v56 = vpop.permute.xlu0 %661 }
  0xd1   : > { %843 = vrot.lane.b32.xlu1 %v2287_v49, %s2653_s22  ;;  %841 = vrot.lane.b32.xlu0 %v2286_v41, %s2653_s22 }
  0xd3   : > { %v3149_v24 = vpop.permute.xlu1 %667  ;;  %v3151_v58 = vpop.permute.xlu0 %665 }
  0xd5   : > { %911 = vrot.lane.b32.xlu1 %v2713_v2, %s2654_s23  ;;  %909 = vrot.lane.b32.xlu0 %v2706_v0, %s2654_s23 }
  0xd7   : > { %v3157_v57 = vpop.permute.xlu1 %671  ;;  %v3159_v61 = vpop.permute.xlu0 %669 }
  0xd9   : > { %915 = vrot.lane.b32.xlu1 %v2720_v4, %s2654_s23  ;;  %913 = vrot.lane.b32.xlu0 %v2723_v5, %s2654_s23 }
  0xdb   : > { %v3165_v41 = vpop.permute.xlu1 %675  ;;  %v3167_v49 = vpop.permute.xlu0 %673 }
  0xdd   : > { %919 = vrot.lane.b32.xlu1 %v2730_v6, %s2654_s23  ;;  %917 = vrot.lane.b32.xlu0 %v2733_v7, %s2654_s23 }
  0xdf   : > { %v3173_v0 = vpop.permute.xlu1 %679  ;;  %v3175_v2 = vpop.permute.xlu0 %677 }
  0xe1   : > { %941 = vrot.lane.b32.xlu1 %v2766_v19, %s2654_s23  ;;  %921 = vrot.lane.b32.xlu0 %v2741_v9, %s2654_s23 }
  0xe3   : > { %v3181_v63 = vpop.permute.xlu1 %683  ;;  %v3183_v25 = vpop.permute.xlu0 %681 }
  0xe5   : > { %1037 = vrot.lane.b32.xlu1 %v2822_v35, %s2655_s24  ;;  %943 = vrot.lane.b32.xlu0 %v2763_v18, %s2654_s23 }
  0xe7   : > { %v3189_v62 = vpop.permute.xlu1 %687  ;;  %v3191_v42 = vpop.permute.xlu0 %685 }
  0xe8   : > { %4257 = vst [vmem:[#allocation44_spill] sm:$0xff] %v3189_v62  ;;  %4258 = vst [vmem:[#allocation45_spill] sm:$0xff] %v3191_v42  ;;  %v1783_v62 = vld [vmem:[%s4178_s1 + $0x10] sm:$0xff] }
  0xe9   : > { %1039 = vrot.lane.b32.xlu1 %v2819_v34, %s2655_s24  ;;  %1069 = vrot.lane.b32.xlu0 %v2878_v51, %s2655_s24  ;;  %v1781_v34 = vld [vmem:[%s4178_s1] sm:$0xff]  ;;  %v1782_v51 = vld [vmem:[%s4178_s1 + $0x8] sm:$0xff] }
  0xeb   : > { %v3197_v19 = vpop.permute.xlu1 %691  ;;  %v3199_v9 = vpop.permute.xlu0 %689 }
  0xec   : > { %4259 = vst [vmem:[#allocation46_spill] sm:$0xff] %v3197_v19  ;;  %4260 = vst [vmem:[#allocation47_spill] sm:$0xff] %v3199_v9  ;;  %v2580_v19 = vpack.c.bf16 %v1782_v51, %v1781_v34  ;;  %v1784_v34 = vld [vmem:[%s4178_s1 + $0x18] sm:$0xff] }
  0xed   : > { %1165 = vrot.lane.b32.xlu1 %v2963_v28, %s2656_s25  ;;  %1071 = vrot.lane.b32.xlu0 %v2875_v50, %s2655_s24  ;;  %v2584_v51 = vpack.c.bf16 %v1784_v34, %v1783_v62 }
  0xee   : > { %2581 = vmatprep.subr.bf16.mxu0 %v2580_v19  ;;  %2588 = vmatprep.subr.bf16.mxu1 %v2580_v19 }
  0xef   : > { %v3205_v18 = vpop.permute.xlu1 %695  ;;  %v3207_v35 = vpop.permute.xlu0 %693  ;;  %2583 = vmatpush3.bf16.msra.mxu0 %v2580_v19  ;;  %2591 = vmatpush3.bf16.msra.mxu1 %v2580_v19 }
  0xf0   : > { %2585 = vmatprep.subr.bf16.mxu0 %v2584_v51  ;;  %2589 = vmatprep.subr.bf16.mxu1 %v2584_v51 }
  0xf1   : > { %1167 = vrot.lane.b32.xlu1 %v2960_v27, %s2656_s25  ;;  %1197 = vrot.lane.b32.xlu0 %v3067_v59, %s2656_s25 }
  0xf3   : > { %v3219_v50 = vpop.permute.xlu1 %699  ;;  %v3221_v9 = vpop.permute.xlu0 %697  ;;  %2587 = vmatpush3.bf16.msra.mxu0 %v2584_v51  ;;  %2592 = vmatpush3.bf16.msra.mxu1 %v2584_v51 }
  0xf4   : > { %4261 = vst [vmem:[#allocation48_spill] sm:$0xff] %v3221_v9 }
  0xf5   : > { %1293 = vrot.lane.b32.xlu1 %v2723_v5, %s2657_s30  ;;  %1199 = vrot.lane.b32.xlu0 %v3064_v16, %s2656_s25  ;;  %v1785_v5 = vld [vmem:[%s4178_s1 + $0x20] sm:$0xf] }
  0xf6   : > { %2530 = vmatprep.subr.msk.mxu0 %vm1890_vm1, %v1785_v5  ;;  %2590 = vmatprep.subr.msk.mxu1 %vm1890_vm1, %v1785_v5 }
  0xf7   : > { %v3233_v42 = vpop.permute.xlu1 %703  ;;  %v3235_v9 = vpop.permute.xlu0 %701  ;;  %2531 = vmatpush3.msk.msra.mxu0 %vm1890_vm1, %v1785_v5  ;;  %2593 = vmatpush3.msk.msra.mxu1 %vm1890_vm1, %v1785_v5 }
  0xf9   : > { %945 = vrot.lane.b32.xlu1 %v2776_v21, %s2654_s23  ;;  %1325 = vrot.lane.b32.xlu0 %v2776_v21, %s2657_s30 }
  0xfb   : > { %v3244_v62 = vpop.permute.xlu1 %707  ;;  %v3246_v19 = vpop.permute.xlu0 %705 }
  0xfc   : > { %4262 = vst [vmem:[#allocation49_spill] sm:$0xff] %v3246_v19 }
  0xfd   : > { %1327 = vrot.lane.b32.xlu1 %v2773_v20, %s2657_s30  ;;  %1295 = vrot.lane.b32.xlu0 %v2720_v4, %s2657_s30 }
  0xff   : > { %v3252_v21 = vpop.permute.xlu1 %711  ;;  %v3254_v34 = vpop.permute.xlu0 %709 }
 0x100   : > { %4263 = vst [vmem:[#allocation50_spill] sm:$0xff] %v3254_v34 }
 0x101   : > { %1453 = vrot.lane.b32.xlu1 %v2888_v53, %s2658_s10  ;;  %1421 = vrot.lane.b32.xlu0 %v2832_v37, %s2658_s10 }
 0x103   : > { %v3260_v51 = vpop.permute.xlu1 %715  ;;  %v3262_v19 = vpop.permute.xlu0 %713 }
 0x104   : > { %4264 = vst [vmem:[#allocation51_spill] sm:$0xff] %v3260_v51 }
 0x105   : > { %1041 = vrot.lane.b32.xlu1 %v2832_v37, %s2655_s24  ;;  %947 = vrot.lane.b32.xlu0 %v2773_v20, %s2654_s23  ;;  %v1523_v20 = vsel %vm1517_vm0, %v2960_v27, %v2935_v11  ;;  %v1522_v37 = vsel %vm1517_vm0, %v2963_v28, %v2937_v12 }
 0x107   : > { %v3268_v4 = vpop.permute.xlu1 %783  ;;  %v3270_v5 = vpop.permute.xlu0 %781 }
 0x108   : > { %4265 = vst [vmem:[#allocation52_spill] sm:$0xff] %v3268_v4  ;;  %4266 = vst [vmem:[#allocation53_spill] sm:$0xff] %v3270_v5 }
 0x109   : > { %1423 = vrot.lane.b32.xlu1 %v2829_v36, %s2658_s10  ;;  %1073 = vrot.lane.b32.xlu0 %v2888_v53, %s2655_s24  ;;  %v1556_v53 = vsel %vm1550_vm2, %v1523_v20, %v3143_v40  ;;  %v1525_v40 = vsel %vm1517_vm0, %v2974_v31, %v2941_v13  ;;  %v1527_v13 = vsel %vm1517_vm0, %v2986_v45, %v2955_v17 }
 0x10a   : > { %v1558_v11 = vsel %vm1550_vm2, %v1525_v40, %v3149_v24  ;;  %v1529_v17 = vsel %vm1517_vm0, %v3004_v8, %v2969_v29  ;;  %v1564_v29 = vsel %vm1550_vm2, %v2992_v47, %v3173_v0  ;;  %v1565_v47 = vsel %vm1550_vm2, %v3013_v44, %v3183_v25 }
 0x10b   : > { %v3276_v34 = vpop.permute.xlu1 %787  ;;  %v3278_v51 = vpop.permute.xlu0 %785 }
 0x10c   : > { %4267 = vst [vmem:[#allocation54_spill] sm:$0xff] %v3276_v34  ;;  %4268 = vst [vmem:[#allocation55_spill] sm:$0xff] %v3278_v51  ;;  %v1555_v34 = vsel %vm1550_vm2, %v1522_v37, %v3145_v56  ;;  %v1524_v56 = vsel %vm1517_vm0, %v2977_v32, %v2943_v14  ;;  %v1526_v14 = vsel %vm1517_vm0, %v2989_v46, %v2957_v26 }
 0x10d   : > { %1043 = vrot.lane.b32.xlu1 %v2829_v36, %s2655_s24  ;;  %1455 = vrot.lane.b32.xlu0 %v2885_v52, %s2658_s10  ;;  %v1557_v12 = vsel %vm1550_vm2, %v1524_v56, %v3151_v58  ;;  %v1559_v58 = vsel %vm1550_vm2, %v1526_v14, %v3159_v61  ;;  %v1528_v61 = vsel %vm1517_vm0, %v3007_v10, %v2971_v30 }
 0x10e   : > { %v1562_v26 = vsel %vm1550_vm2, %v1529_v17, %v3165_v41  ;;  %v1563_v30 = vsel %vm1550_vm2, %v2995_v48, %v3175_v2 }
 0x10f   : > { %v792_v36 = vpop.permute.xlu1 %791  ;;  %v790_v51 = vpop.permute.xlu0 %789 }
 0x110   : > { %v3295_v4 = vsel %vm1583_vm3, %v1556_v53, %v792_v36  ;;  %v3298_v5 = vsel %vm1583_vm3, %v1555_v34, %v790_v51 }
 0x111   : > { %1169 = vrot.lane.b32.xlu1 %v2977_v32, %s2656_s25  ;;  %1075 = vrot.lane.b32.xlu0 %v2885_v52, %s2655_s24  ;;  %v1560_v32 = vsel %vm1550_vm2, %v1527_v13, %v3157_v57  ;;  %v1561_v57 = vsel %vm1550_vm2, %v1528_v61, %v3167_v49 }
 0x113   : > { %v796_v27 = vpop.permute.xlu1 %795  ;;  %v794_v28 = vpop.permute.xlu0 %793 }
 0x114   : > { %v3315_v34 = vsel %vm1583_vm3, %v1558_v11, %v796_v27  ;;  %v3318_v52 = vsel %vm1583_vm3, %v1557_v12, %v794_v28 }
 0x115   : > { %1171 = vrot.lane.b32.xlu1 %v2974_v31, %s2656_s25  ;;  %1201 = vrot.lane.b32.xlu0 %v3081_v1, %s2656_s25 }
 0x117   : > { %v800_v24 = vpop.permute.xlu1 %799  ;;  %v798_v51 = vpop.permute.xlu0 %797 }
 0x118   : > { %v3335_v31 = vsel %vm1583_vm3, %v1560_v32, %v800_v24  ;;  %v3338_v20 = vsel %vm1583_vm3, %v1559_v58, %v798_v51  ;;  %v4276_v24 = vld [vmem:[#allocation32_spill] sm:$0xff] }
 0x119   : > { %1297 = vrot.lane.b32.xlu1 %v2733_v7, %s2657_s30  ;;  %1203 = vrot.lane.b32.xlu0 %v3078_v3, %s2656_s25 }
 0x11b   : > { %v804_v37 = vpop.permute.xlu1 %803  ;;  %v802_v53 = vpop.permute.xlu0 %801 }
 0x11c   : > { %v3355_v7 = vsel %vm1583_vm3, %v1562_v26, %v804_v37  ;;  %v3358_v36 = vsel %vm1583_vm3, %v1561_v57, %v802_v53  ;;  %v4277_v37 = vld [vmem:[#allocation27_spill] sm:$0xff]  ;;  %v4278_v53 = vld [vmem:[#allocation34_spill] sm:$0xff] }
 0x11d   : > { %949 = vrot.lane.b32.xlu1 %v2786_v23, %s2654_s23  ;;  %1329 = vrot.lane.b32.xlu0 %v2786_v23, %s2657_s30  ;;  %v1566_v23 = vsel %vm1550_vm2, %v3010_v43, %v3181_v63  ;;  %v1539_v63 = vsel %vm1517_vm0, %v3064_v16, %v3031_v15 }
 0x11f   : > { %v808_v41 = vpop.permute.xlu1 %807  ;;  %v806_v49 = vpop.permute.xlu0 %805 }
 0x120   : > { %v3371_v40 = vsel %vm1583_vm3, %v1564_v29, %v808_v41  ;;  %v3374_v56 = vsel %vm1583_vm3, %v1563_v30, %v806_v49  ;;  %v4279_v29 = vld [vmem:[#allocation28_spill] sm:$0xff]  ;;  %v4281_v49 = vld [vmem:[#allocation49_spill] sm:$0xff] }
 0x121   : > { %1331 = vrot.lane.b32.xlu1 %v2783_v22, %s2657_s30  ;;  %1299 = vrot.lane.b32.xlu0 %v2730_v6, %s2657_s30 }
 0x123   : > { %v812_v48 = vpop.permute.xlu1 %811  ;;  %v810_v0 = vpop.permute.xlu0 %809 }
 0x124   : > { %v3387_v2 = vsel %vm1583_vm3, %v1566_v23, %v812_v48  ;;  %v3390_v11 = vsel %vm1583_vm3, %v1565_v47, %v810_v0 }
 0x125   : > { %4269 = vst [vmem:[#allocation56_spill] sm:$0xff] %v3387_v2  ;;  %4270 = vst [vmem:[#allocation57_spill] sm:$0xff] %v3390_v11  ;;  %1457 = vrot.lane.b32.xlu1 %v2898_v55, %s2658_s10  ;;  %1425 = vrot.lane.b32.xlu0 %v2842_v39, %s2658_s10  ;;  %v4304_v2 = vld [vmem:[#allocation53_spill] sm:$0xff] }
 0x127   : > { %v3396_v6 = vpop.permute.xlu1 %815  ;;  %v3398_v43 = vpop.permute.xlu0 %813 }
 0x129   : > { %1045 = vrot.lane.b32.xlu1 %v2842_v39, %s2655_s24  ;;  %951 = vrot.lane.b32.xlu0 %v2783_v22, %s2654_s23  ;;  %v1538_v39 = vsel %vm1517_vm0, %v3067_v59, %v3033_v60  ;;  %v1572_v22 = vsel %vm1550_vm2, %v1539_v63, %v3205_v18  ;;  %v1541_v59 = vsel %vm1517_vm0, %v3078_v3, %v3045_v33  ;;  %v4271_v60 = vld [vmem:[#allocation22_spill] sm:$0xff]  ;;  %v4272_v18 = vld [vmem:[#allocation48_spill] sm:$0xff]  ;;  %v4274_v3 = vld [vmem:[#allocation31_spill] sm:$0xff] }
 0x12a   : > { %v1571_v12 = vsel %vm1550_vm2, %v1538_v39, %v3207_v35  ;;  %v1540_v15 = vsel %vm1517_vm0, %v3081_v1, %v4271_v60  ;;  %v1574_v16 = vsel %vm1550_vm2, %v1541_v59, %v3219_v50  ;;  %v4273_v1 = vld [vmem:[#allocation25_spill] sm:$0xff]  ;;  %v4275_v50 = vld [vmem:[#allocation26_spill] sm:$0xff] }
 0x12b   : > { %v3404_v25 = vpop.permute.xlu1 %819  ;;  %v3406_v44 = vpop.permute.xlu0 %817  ;;  %v1573_v35 = vsel %vm1550_vm2, %v1540_v15, %v4272_v18  ;;  %v1543_v33 = vsel %vm1517_vm0, %v4274_v3, %v4273_v1  ;;  %v1542_v51 = vsel %vm1517_vm0, %v4276_v24, %v4275_v50  ;;  %v4282_v63 = vld [vmem:[#allocation2_spill] sm:$0xff]  ;;  %v4283_v39 = vld [vmem:[#allocation29_spill] sm:$0xff]  ;;  %v4291_v50 = vld [vmem:[#allocation51_spill] sm:$0xff] }
 0x12c   : > { %v1576_v17 = vsel %vm1550_vm2, %v1543_v33, %v3233_v42  ;;  %v1575_v61 = vsel %vm1550_vm2, %v1542_v51, %v3235_v9  ;;  %v1545_v42 = vsel %vm1517_vm0, %v4278_v53, %v4277_v37  ;;  %v4280_v9 = vld [vmem:[#allocation35_spill] sm:$0xff]  ;;  %v4287_v60 = vld [vmem:[#allocation50_spill] sm:$0xff]  ;;  %v4289_v1 = vld [vmem:[#allocation33_spill] sm:$0xff] }
 0x12d   : > { %1427 = vrot.lane.b32.xlu1 %v2839_v38, %s2658_s10  ;;  %1077 = vrot.lane.b32.xlu0 %v2898_v55, %s2655_s24  ;;  %v1544_v30 = vsel %vm1517_vm0, %v4280_v9, %v4279_v29  ;;  %v1578_v41 = vsel %vm1550_vm2, %v1545_v42, %v3244_v62  ;;  %v4284_v62 = vld [vmem:[#allocation39_spill] sm:$0xff] }
 0x12e   : > { %v1577_v23 = vsel %vm1550_vm2, %v1544_v30, %v4281_v49  ;;  %v2389_v33 = vld [vmem:[%s2703_s19 + $0x69] sm:$0xff] }
 0x12f   : > { %v824_v27 = vpop.permute.xlu1 %823  ;;  %v822_v28 = vpop.permute.xlu0 %821  ;;  %v4294_v42 = vld [vmem:[#allocation3_spill] sm:$0xff] }
 0x130   : > { %v3423_v13 = vsel %vm1583_vm3, %v1572_v22, %v824_v27  ;;  %v3426_v55 = vsel %vm1583_vm3, %v1571_v12, %v822_v28  ;;  %v1547_v22 = vsel %vm1517_vm0, %v4284_v62, %v4283_v39  ;;  %v4285_v12 = vld [vmem:[#allocation30_spill] sm:$0xff]  ;;  %v4286_v27 = vld [vmem:[#allocation40_spill] sm:$0xff] }
 0x131   : > { %1047 = vrot.lane.b32.xlu1 %v2839_v38, %s2655_s24  ;;  %1459 = vrot.lane.b32.xlu0 %v2895_v54, %s2658_s10  ;;  %v1546_v28 = vsel %vm1517_vm0, %v4286_v27, %v4285_v12  ;;  %v1580_v59 = vsel %vm1550_vm2, %v1547_v22, %v3252_v21  ;;  %v4297_v22 = vld [vmem:[#allocation7_spill] sm:$0xff]  ;;  %v4298_v12 = vld [vmem:[#allocation5_spill] sm:$0xff] }
 0x132   : > { %v1579_v15 = vsel %vm1550_vm2, %v1546_v28, %v4287_v60 }
 0x133   : > { %v828_v14 = vpop.permute.xlu1 %827  ;;  %v826_v32 = vpop.permute.xlu0 %825 }
 0x134   : > { %v3443_v38 = vsel %vm1583_vm3, %v1574_v16, %v828_v14  ;;  %v3446_v58 = vsel %vm1583_vm3, %v1573_v35, %v826_v32  ;;  %v4288_v32 = vld [vmem:[#allocation4_spill] sm:$0xff] }
 0x135   : > { %1173 = vrot.lane.b32.xlu1 %v2989_v46, %s2656_s25  ;;  %1079 = vrot.lane.b32.xlu0 %v2895_v54, %s2655_s24 }
 0x137   : > { %v832_v26 = vpop.permute.xlu1 %831  ;;  %v830_v57 = vpop.permute.xlu0 %829 }
 0x138   : > { %v3463_v46 = vsel %vm1583_vm3, %v1576_v17, %v832_v26  ;;  %v3466_v54 = vsel %vm1583_vm3, %v1575_v61, %v830_v57 }
 0x139   : > { %1175 = vrot.lane.b32.xlu1 %v2986_v45, %s2656_s25  ;;  %1205 = vrot.lane.b32.xlu0 %v4276_v24, %s2656_s25  ;;  %v4292_v24 = vld [vmem:[#allocation36_spill] sm:$0xff] }
 0x13a   : > { %v1582_v51 = vsel %vm1550_vm2, %v4292_v24, %v4291_v50  ;;  %v2407_v50 = vld [vmem:[%s2703_s19 + $0x141] sm:$0xff] }
 0x13b   : > { %v836_v47 = vpop.permute.xlu1 %835  ;;  %v834_v48 = vpop.permute.xlu0 %833  ;;  %v2391_v24 = vld [vmem:[%s2703_s19 + $0x81] sm:$0xff] }
 0x13c   : > { %v3483_v45 = vsel %vm1583_vm3, %v1578_v41, %v836_v47  ;;  %v3486_v0 = vsel %vm1583_vm3, %v1577_v23, %v834_v48  ;;  %v4295_v41 = vld [vmem:[#allocation8_spill] sm:$0xff] }
 0x13d   : > { %1301 = vrot.lane.b32.xlu1 %v4282_v63, %s2657_s30  ;;  %1207 = vrot.lane.b32.xlu0 %v4274_v3, %s2656_s25  ;;  %v4290_v3 = vld [vmem:[#allocation43_spill] sm:$0xff] }
 0x13e   : > { %v1548_v21 = vsel %vm1517_vm0, %v4290_v3, %v4289_v1  ;;  %v2390_v1 = vld [vmem:[%s2703_s19 + $0x79] sm:$0xff] }
 0x13f   : > { %v840_v16 = vpop.permute.xlu1 %839  ;;  %v838_v18 = vpop.permute.xlu0 %837  ;;  %v1581_v17 = vsel %vm1550_vm2, %v1548_v21, %v3262_v19  ;;  %v4296_v19 = vld [vmem:[#allocation6_spill] sm:$0xff] }
 0x140   : > { %v3503_v35 = vsel %vm1583_vm3, %v1580_v59, %v840_v16  ;;  %v3506_v14 = vsel %vm1583_vm3, %v1579_v15, %v838_v18 }
 0x141   : > { %953 = vrot.lane.b32.xlu1 %v4288_v32, %s2654_s23  ;;  %1333 = vrot.lane.b32.xlu0 %v4288_v32, %s2657_s30  ;;  %v2406_v32 = vld [vmem:[%s2703_s19 + $0x139] sm:$0xff] }
 0x143   : > { %v844_v61 = vpop.permute.xlu1 %843  ;;  %v842_v26 = vpop.permute.xlu0 %841 }
 0x144   : > { %v3522_v57 = vsel %vm1583_vm3, %v1582_v51, %v844_v61  ;;  %v3525_v37 = vsel %vm1583_vm3, %v1581_v17, %v842_v26  ;;  %v4299_v17 = vld [vmem:[#allocation11_spill] sm:$0xff]  ;;  %v4300_v26 = vld [vmem:[#allocation17_spill] sm:$0xff] }
 0x145   : > { %4293 = vst [vmem:[#allocation22_spill] sm:$0xff] %v3522_v57  ;;  %1335 = vrot.lane.b32.xlu1 %v4294_v42, %s2657_s30  ;;  %1303 = vrot.lane.b32.xlu0 %v2389_v33, %s2657_s30 }
 0x147   : > { %v3530_v29 = vpop.permute.xlu1 %911  ;;  %v910_v30 = vpop.permute.xlu0 %909 }
 0x149   : > { %1461 = vrot.lane.b32.xlu1 %v4295_v41, %s2658_s10  ;;  %1429 = vrot.lane.b32.xlu0 %v4296_v19, %s2658_s10 }
 0x14b   : > { %v3536_v49 = vpop.permute.xlu1 %915  ;;  %v3538_v23 = vpop.permute.xlu0 %913 }
 0x14d   : > { %955 = vrot.lane.b32.xlu1 %v4294_v42, %s2654_s23  ;;  %923 = vrot.lane.b32.xlu0 %v2389_v33, %s2654_s23  ;;  %v4301_v42 = vld [vmem:[#allocation21_spill] sm:$0xff] }
 0x14f   : > { %v3543_v47 = vpop.permute.xlu1 %919  ;;  %v3545_v48 = vpop.permute.xlu0 %917 }
 0x151   : > { %1081 = vrot.lane.b32.xlu1 %v4295_v41, %s2655_s24  ;;  %1049 = vrot.lane.b32.xlu0 %v4296_v19, %s2655_s24  ;;  %v1534_v41 = vsel %vm1517_vm0, %v4301_v42, %v4300_v26  ;;  %v4302_v19 = vld [vmem:[#allocation38_spill] sm:$0xff] }
 0x153   : > { %v942_v63 = vpop.permute.xlu1 %941  ;;  %v3551_v39 = vpop.permute.xlu0 %921 }
 0x155   : > { %1463 = vrot.lane.b32.xlu1 %v4297_v22, %s2658_s10  ;;  %1431 = vrot.lane.b32.xlu0 %v4298_v12, %s2658_s10 }
 0x157   : > { %v1038_v28 = vpop.permute.xlu1 %1037  ;;  %v3557_v59 = vpop.permute.xlu0 %943 }
 0x159   : > { %1083 = vrot.lane.b32.xlu1 %v4297_v22, %s2655_s24  ;;  %1051 = vrot.lane.b32.xlu0 %v4298_v12, %s2655_s24  ;;  %v4303_v12 = vld [vmem:[#allocation45_spill] sm:$0xff] }
 0x15b   : > { %v3563_v60 = vpop.permute.xlu1 %1039  ;;  %v1070_v15 = vpop.permute.xlu0 %1069 }
 0x15d   : > { %1209 = vrot.lane.b32.xlu1 %v4280_v9, %s2656_s25  ;;  %1177 = vrot.lane.b32.xlu0 %v3007_v10, %s2656_s25 }
 0x15f   : > { %v1166_v16 = vpop.permute.xlu1 %1165  ;;  %v3569_v18 = vpop.permute.xlu0 %1071 }
 0x161   : > { %1211 = vrot.lane.b32.xlu1 %v4278_v53, %s2656_s25  ;;  %1179 = vrot.lane.b32.xlu0 %v3004_v8, %s2656_s25  ;;  %v199_v53 = vld [vmem:[%s2703_s19] sm:$0xff] }
 0x162   : > { %v1518_v61 = vsel %vm1517_vm0, %v199_v53, %v4299_v17 }
 0x163   : > { %v1168_v21 = vpop.permute.xlu1 %1167  ;;  %v1198_v33 = vpop.permute.xlu0 %1197  ;;  %v1551_v22 = vsel %vm1550_vm2, %v1518_v61, %v4302_v19  ;;  %v4305_v19 = vld [vmem:[#allocation9_spill] sm:$0xff] }
 0x164   : > { %v1584_v53 = vsel %vm1583_vm3, %v1551_v22, %v4304_v2  ;;  %v200_v2 = vld [vmem:[%s2703_s19 + $0x8] sm:$0xff] }
 0x165   : > { %1337 = vrot.lane.b32.xlu1 %v2406_v32, %s2657_s30  ;;  %1305 = vrot.lane.b32.xlu0 %v2390_v1, %s2657_s30  ;;  %v1617_v57 = vsel %vm1616_vm4, %v1584_v53, %v910_v30 }
 0x166   : > { %v1650_v61 = vsel %vm1649_vm5, %v1617_v57, %v1038_v28 }
 0x167   : > { %v1294_v10 = vpop.permute.xlu1 %1293  ;;  %v3579_v9 = vpop.permute.xlu0 %1199 }
 0x169   : > { %957 = vrot.lane.b32.xlu1 %v2406_v32, %s2654_s23  ;;  %925 = vrot.lane.b32.xlu0 %v2390_v1, %s2654_s23  ;;  %v1567_v32 = vsel %vm1550_vm2, %v1534_v41, %v4303_v12  ;;  %v2422_v1 = vld [vmem:[%s2703_s19 + $0x7a] sm:$0xff] }
 0x16a   : > { %v1600_v17 = vsel %vm1583_vm3, %v1567_v32, %v3398_v43  ;;  %v1683_v43 = vsel %vm1682_vm6, %v1650_v61, %v1166_v16  ;;  %v4307_v16 = vld [vmem:[#allocation37_spill] sm:$0xff] }
 0x16b   : > { %v3586_v8 = vpop.permute.xlu1 %945  ;;  %v1326_v51 = vpop.permute.xlu0 %1325  ;;  %v1633_v11 = vsel %vm1616_vm4, %v1600_v17, %v942_v63  ;;  %v1716_v30 = vsel %vm1715_vm7, %v1683_v43, %v1294_v10  ;;  %v2344_v10 = vld [vmem:[%s2703_s19 + $0x13a] sm:$0xff]  ;;  %v4311_v43 = vld [vmem:[#allocation44_spill] sm:$0xff] }
 0x16c   : > { %v1666_v41 = vsel %vm1649_vm5, %v1633_v11, %v1070_v15  ;;  %v4306_v15 = vld [vmem:[#allocation13_spill] sm:$0xff] }
 0x16d   : > { %1339 = vrot.lane.b32.xlu1 %v2407_v50, %s2657_s30  ;;  %1307 = vrot.lane.b32.xlu0 %v2391_v24, %s2657_s30  ;;  %v1699_v22 = vsel %vm1682_vm6, %v1666_v41, %v1198_v33  ;;  %v1519_v32 = vsel %vm1517_vm0, %v200_v2, %v4306_v15  ;;  %v4309_v41 = vld [vmem:[#allocation16_spill] sm:$0xff] }
 0x16e   : > { %v1732_v63 = vsel %vm1715_vm7, %v1699_v22, %v1326_v51  ;;  %v1552_v33 = vsel %vm1550_vm2, %v1519_v32, %v4307_v16  ;;  %v4308_v51 = vld [vmem:[#allocation52_spill] sm:$0xff] }
 0x16f   : > { %v1328_v26 = vpop.permute.xlu1 %1327  ;;  %v1296_v42 = vpop.permute.xlu0 %1295  ;;  %v1585_v53 = vsel %vm1583_vm3, %v1552_v33, %v4308_v51  ;;  %v2408_v51 = vld [vmem:[%s2703_s19 + $0x151] sm:$0xff] }
 0x171   : > { %1465 = vrot.lane.b32.xlu1 %v4305_v19, %s2658_s10  ;;  %1433 = vrot.lane.b32.xlu0 %v2422_v1, %s2658_s10 }
 0x173   : > { %v1454_v12 = vpop.permute.xlu1 %1453  ;;  %v1422_v57 = vpop.permute.xlu0 %1421 }
 0x174   : > { %v1749_v11 = vsel %vm1748_vm8, %v1716_v30, %v1422_v57  ;;  %v1765_v28 = vsel %vm1748_vm8, %v1732_v63, %v1454_v12  ;;  %v2439_v63 = vld [vmem:[%s2703_s19 + $0x142] sm:$0xff] }
 0x175   : > { %959 = vrot.lane.b32.xlu1 %v2407_v50, %s2654_s23  ;;  %927 = vrot.lane.b32.xlu0 %v2391_v24, %s2654_s23  ;;  %v1618_v50 = vsel %vm1616_vm4, %v1585_v53, %v3530_v29  ;;  %v4310_v24 = vld [vmem:[#allocation20_spill] sm:$0xff]  ;;  %v2423_v12 = vld [vmem:[%s2703_s19 + $0x82] sm:$0xff] }
 0x176   : > { %2532 = vmatprep.mubr.msk.f32.mxu0 %vm1793_vm9, %v1749_v11  ;;  %2556 = vmatprep.mubr.msk.f32.mxu1 %vm1793_vm9, %v1765_v28  ;;  %v1535_v19 = vsel %vm1517_vm0, %v4310_v24, %v4309_v41  ;;  %v1651_v2 = vsel %vm1649_vm5, %v1618_v50, %v3563_v60  ;;  %v2392_v53 = vld [vmem:[%s2703_s19 + $0x91] sm:$0xff] }
 0x177   : > { %v1042_v17 = vpop.permute.xlu1 %1041  ;;  %v3629_v61 = vpop.permute.xlu0 %947  ;;  %v1568_v22 = vsel %vm1550_vm2, %v1535_v19, %v4311_v43  ;;  %v1684_v30 = vsel %vm1682_vm6, %v1651_v2, %v1168_v21  ;;  %v4312_v19 = vld [vmem:[#allocation10_spill] sm:$0xff] }
 0x178   : > { %v1601_v29 = vsel %vm1583_vm3, %v1568_v22, %v3396_v6  ;;  %v1717_v57 = vsel %vm1715_vm7, %v1684_v30, %v1296_v42  ;;  %v4313_v2 = vld [vmem:[#allocation14_spill] sm:$0xff]  ;;  %v4315_v22 = vld [vmem:[#allocation24_spill] sm:$0xff] }
 0x179   : > { %1085 = vrot.lane.b32.xlu1 %v2344_v10, %s2655_s24  ;;  %1053 = vrot.lane.b32.xlu0 %v2422_v1, %s2655_s24  ;;  %v1634_v60 = vsel %vm1616_vm4, %v1601_v29, %v3557_v59  ;;  %v1520_v43 = vsel %vm1517_vm0, %v4313_v2, %v4312_v19  ;;  %v4317_v29 = vld [vmem:[#allocation47_spill] sm:$0xff]  ;;  %v2440_v19 = vld [vmem:[%s2703_s19 + $0x152] sm:$0xff] }
 0x17a   : > { %v1667_v15 = vsel %vm1649_vm5, %v1634_v60, %v3569_v18  ;;  %v2360_v18 = vld [vmem:[%s2703_s19 + $0x90] sm:$0xff]  ;;  %v2393_v60 = vld [vmem:[%s2703_s19 + $0x99] sm:$0xff] }
 0x17b   : > { %v1424_v11 = vpop.permute.xlu1 %1423  ;;  %v1074_v28 = vpop.permute.xlu0 %1073  ;;  %v1700_v6 = vsel %vm1682_vm6, %v1667_v15, %v3579_v9  ;;  %v2424_v2 = vld [vmem:[%s2703_s19 + $0x92] sm:$0xff] }
 0x17c   : > { %v1750_v1 = vsel %vm1748_vm8, %v1717_v57, %v1424_v11  ;;  %v1733_v21 = vsel %vm1715_vm7, %v1700_v6, %v1328_v26  ;;  %v2361_v26 = vld [vmem:[%s2703_s19 + $0x98] sm:$0xff] }
 0x17d   : > { %1467 = vrot.lane.b32.xlu1 %v2439_v63, %s2658_s10  ;;  %1435 = vrot.lane.b32.xlu0 %v2423_v12, %s2658_s10  ;;  %v2409_v11 = vld [vmem:[%s2703_s19 + $0x159] sm:$0xff] }
 0x17e   : > { %2533 = vmatmul.mubr.msk.f32.vlgmr.msra.gmra.mrb[0].mxu0 %vm1793_vm9, %v1750_v1  ;;  %v4318_v1 = vld [vmem:[#allocation55_spill] sm:$0xff] }
 0x17f   : > { %v3659_v42 = vpop.permute.xlu1 %1043  ;;  %v1456_v59 = vpop.permute.xlu0 %1455 }
 0x180   : > { %v1766_v32 = vsel %vm1748_vm8, %v1733_v21, %v1456_v59 }
 0x181   : > { %1087 = vrot.lane.b32.xlu1 %v2439_v63, %s2655_s24  ;;  %1055 = vrot.lane.b32.xlu0 %v2423_v12, %s2655_s24  ;;  %v4316_v63 = vld [vmem:[#allocation42_spill] sm:$0xff] }
 0x182   : > { %2557 = vmatmul.mubr.msk.f32.vlgmr.msra.gmra.mrb[0].mxu1 %vm1793_vm9, %v1766_v32  ;;  %v1553_v12 = vsel %vm1550_vm2, %v1520_v43, %v4316_v63 }
 0x183   : > { %v1170_v16 = vpop.permute.xlu1 %1169  ;;  %v3666_v9 = vpop.permute.xlu0 %1075  ;;  %v1586_v15 = vsel %vm1583_vm3, %v1553_v12, %v4318_v1  ;;  %v4323_v1 = vld [vmem:[#allocation18_spill] sm:$0xff] }
 0x184   : > { %v1619_v32 = vsel %vm1616_vm4, %v1586_v15, %v3538_v23  ;;  %v4324_v15 = vld [vmem:[#allocation23_spill] sm:$0xff] }
 0x185   : > { %1213 = vrot.lane.b32.xlu1 %v4286_v27, %s2656_s25  ;;  %1181 = vrot.lane.b32.xlu0 %v2360_v18, %s2656_s25 }
 0x187   : > { %v1172_v33 = vpop.permute.xlu1 %1171  ;;  %v1202_v10 = vpop.permute.xlu0 %1201 }
 0x189   : > { %1215 = vrot.lane.b32.xlu1 %v4284_v62, %s2656_s25  ;;  %1183 = vrot.lane.b32.xlu0 %v2361_v26, %s2656_s25  ;;  %v4314_v62 = vld [vmem:[#allocation19_spill] sm:$0xff]  ;;  %v1652_v26 = vsel %vm1649_vm5, %v1619_v32, %v1042_v17 }
 0x18a   : > { %v1536_v30 = vsel %vm1517_vm0, %v4315_v22, %v4314_v62  ;;  %v4319_v22 = vld [vmem:[#allocation12_spill] sm:$0xff] }
 0x18b   : > { %v1298_v50 = vpop.permute.xlu1 %1297  ;;  %v1204_v41 = vpop.permute.xlu0 %1203  ;;  %v1569_v57 = vsel %vm1550_vm2, %v1536_v30, %v4317_v29  ;;  %v4320_v30 = vld [vmem:[#allocation15_spill] sm:$0xff] }
 0x18c   : > { %v1602_v6 = vsel %vm1583_vm3, %v1569_v57, %v3406_v44  ;;  %v1521_v63 = vsel %vm1517_vm0, %v4320_v30, %v4319_v22 }
 0x18d   : > { %1341 = vrot.lane.b32.xlu1 %v2408_v51, %s2657_s30  ;;  %1309 = vrot.lane.b32.xlu0 %v2392_v53, %s2657_s30  ;;  %v1635_v18 = vsel %vm1616_vm4, %v1602_v6, %v3586_v8  ;;  %v1537_v6 = vsel %vm1517_vm0, %v4324_v15, %v4323_v1 }
 0x18f   : > { %v3679_v27 = vpop.permute.xlu1 %949  ;;  %v1330_v24 = vpop.permute.xlu0 %1329 }
 0x190   : > { %v1637_v1 = vsel %vm1616_vm4, %v3426_v55, %v3679_v27 }
 0x191   : > { %961 = vrot.lane.b32.xlu1 %v2408_v51, %s2654_s23  ;;  %929 = vrot.lane.b32.xlu0 %v2392_v53, %s2654_s23  ;;  %v1668_v51 = vsel %vm1649_vm5, %v1635_v18, %v1074_v28  ;;  %v1685_v53 = vsel %vm1682_vm6, %v1652_v26, %v1170_v16  ;;  %v4321_v16 = vld [vmem:[#allocation41_spill] sm:$0xff]  ;;  %v4325_v18 = vld [vmem:[#allocation46_spill] sm:$0xff] }
 0x192   : > { %v1701_v44 = vsel %vm1682_vm6, %v1668_v51, %v1202_v10  ;;  %v1718_v43 = vsel %vm1715_vm7, %v1685_v53, %v1298_v50  ;;  %v1554_v10 = vsel %vm1550_vm2, %v1521_v63, %v4321_v16  ;;  %v4322_v50 = vld [vmem:[#allocation54_spill] sm:$0xff]  ;;  %v1570_v26 = vsel %vm1550_vm2, %v1537_v6, %v4325_v18  ;;  %v2410_v63 = vld [vmem:[%s2703_s19 + $0x169] sm:$0xff] }
 0x193   : > { %v1332_v21 = vpop.permute.xlu1 %1331  ;;  %v1300_v59 = vpop.permute.xlu0 %1299  ;;  %v1734_v23 = vsel %vm1715_vm7, %v1701_v44, %v1330_v24  ;;  %v1587_v24 = vsel %vm1583_vm3, %v1554_v10, %v4322_v50  ;;  %v2394_v16 = vld [vmem:[%s2703_s19 + $0xa9] sm:$0xff] }
 0x194   : > { %v1620_v57 = vsel %vm1616_vm4, %v1587_v24, %v3536_v49  ;;  %v1603_v49 = vsel %vm1583_vm3, %v1570_v26, %v3404_v25  ;;  %v2441_v25 = vld [vmem:[%s2703_s19 + $0x15a] sm:$0xff]  ;;  %v2411_v26 = vld [vmem:[%s2703_s19 + $0x171] sm:$0xff] }
 0x195   : > { %1343 = vrot.lane.b32.xlu1 %v2409_v11, %s2657_s30  ;;  %1311 = vrot.lane.b32.xlu0 %v2393_v60, %s2657_s30  ;;  %v1653_v32 = vsel %vm1649_vm5, %v1620_v57, %v3659_v42  ;;  %v1636_v42 = vsel %vm1616_vm4, %v1603_v49, %v3629_v61  ;;  %v1621_v57 = vsel %vm1616_vm4, %v3298_v5, %v3545_v48  ;;  %v2395_v5 = vld [vmem:[%s2703_s19 + $0xb1] sm:$0xff] }
 0x196   : > { %v1686_v51 = vsel %vm1682_vm6, %v1653_v32, %v1172_v33 }
 0x197   : > { %v1458_v62 = vpop.permute.xlu1 %1457  ;;  %v1426_v8 = vpop.permute.xlu0 %1425  ;;  %v1719_v53 = vsel %vm1715_vm7, %v1686_v51, %v1300_v59  ;;  %v2425_v59 = vld [vmem:[%s2703_s19 + $0x9a] sm:$0xff] }
 0x198   : > { %v1767_v17 = vsel %vm1748_vm8, %v1734_v23, %v1458_v62  ;;  %v1751_v28 = vsel %vm1748_vm8, %v1718_v43, %v1426_v8 }
 0x199   : > { %1469 = vrot.lane.b32.xlu1 %v2440_v19, %s2658_s10  ;;  %1437 = vrot.lane.b32.xlu0 %v2424_v2, %s2658_s10 }
 0x19a   : > { %2535 = vmatprep.mubr.msk.f32.mxu0 %vm1793_vm9, %v1751_v28  ;;  %2559 = vmatprep.mubr.msk.f32.mxu1 %vm1793_vm9, %v1767_v17  ;;  %v2379_v17 = vld [vmem:[%s2703_s19 + $0x170] sm:$0xff] }
 0x19b   : > { %v1046_v12 = vpop.permute.xlu1 %1045  ;;  %v3726_v29 = vpop.permute.xlu0 %951  ;;  %v2363_v28 = vld [vmem:[%s2703_s19 + $0xb0] sm:$0xff] }
 0x19c   : > { %v1654_v15 = vsel %vm1649_vm5, %v1621_v57, %v1046_v12 }
 0x19d   : > { %963 = vrot.lane.b32.xlu1 %v2409_v11, %s2654_s23  ;;  %931 = vrot.lane.b32.xlu0 %v2393_v60, %s2654_s23  ;;  %v1669_v60 = vsel %vm1649_vm5, %v1636_v42, %v3666_v9 }
 0x19e   : > { %v1702_v33 = vsel %vm1682_vm6, %v1669_v60, %v1204_v41 }
 0x19f   : > { %v1428_v44 = vpop.permute.xlu1 %1427  ;;  %v1078_v43 = vpop.permute.xlu0 %1077  ;;  %v1735_v23 = vsel %vm1715_vm7, %v1702_v33, %v1332_v21  ;;  %v2362_v21 = vld [vmem:[%s2703_s19 + $0xa8] sm:$0xff]  ;;  %v1622_v33 = vsel %vm1616_vm4, %v3295_v4, %v3543_v47 }
 0x1a0   : > { %v1752_v11 = vsel %vm1748_vm8, %v1719_v53, %v1428_v44  ;;  %v1670_v6 = vsel %vm1649_vm5, %v1637_v1, %v1078_v43  ;;  %v2442_v53 = vld [vmem:[%s2703_s19 + $0x16a] sm:$0xff]  ;;  %v2412_v1 = vld [vmem:[%s2703_s19 + $0x181] sm:$0xff] }
 0x1a1   : > { %1089 = vrot.lane.b32.xlu1 %v2440_v19, %s2655_s24  ;;  %1057 = vrot.lane.b32.xlu0 %v2424_v2, %s2655_s24  ;;  %v2426_v44 = vld [vmem:[%s2703_s19 + $0xaa] sm:$0xff] }
 0x1a2   : > { %2536 = vmatmul.mubr.msk.f32.gmra.mrb[2].mxu0 %vm1793_vm9, %v1752_v11 }
 0x1a3   : > { %v1048_v61 = vpop.permute.xlu1 %1047  ;;  %v1460_v62 = vpop.permute.xlu0 %1459 }
 0x1a4   : > { %v1768_v8 = vsel %vm1748_vm8, %v1735_v23, %v1460_v62 }
 0x1a5   : > { %1471 = vrot.lane.b32.xlu1 %v2441_v25, %s2658_s10  ;;  %1439 = vrot.lane.b32.xlu0 %v2425_v59, %s2658_s10 }
 0x1a6   : > { %2560 = vmatmul.mubr.msk.f32.gmra.mrb[2].mxu1 %vm1793_vm9, %v1768_v8 }
 0x1a7   : > { %v1174_v9 = vpop.permute.xlu1 %1173  ;;  %v1080_v41 = vpop.permute.xlu0 %1079 }
 0x1a8   : > { %v1687_v32 = vsel %vm1682_vm6, %v1654_v15, %v1174_v9  ;;  %v2396_v15 = vld [vmem:[%s2703_s19 + $0xc1] sm:$0xff] }
 0x1a9   : > { %1091 = vrot.lane.b32.xlu1 %v2441_v25, %s2655_s24  ;;  %1059 = vrot.lane.b32.xlu0 %v2425_v59, %s2655_s24  ;;  %v1638_v25 = vsel %vm1616_vm4, %v3423_v13, %v3726_v29  ;;  %v1655_v59 = vsel %vm1649_vm5, %v1622_v33, %v1048_v61  ;;  %v2428_v33 = vld [vmem:[%s2703_s19 + $0xc2] sm:$0xff] }
 0x1aa   : > { %v1671_v23 = vsel %vm1649_vm5, %v1638_v25, %v1080_v41  ;;  %v2443_v41 = vld [vmem:[%s2703_s19 + $0x172] sm:$0xff] }
 0x1ab   : > { %v1176_v19 = vpop.permute.xlu1 %1175  ;;  %v1206_v2 = vpop.permute.xlu0 %1205 }
 0x1ac   : > { %v1703_v18 = vsel %vm1682_vm6, %v1670_v6, %v1206_v2  ;;  %v1688_v62 = vsel %vm1682_vm6, %v1655_v59, %v1176_v19 }
 0x1ad   : > { %1217 = vrot.lane.b32.xlu1 %v4290_v3, %s2656_s25  ;;  %1185 = vrot.lane.b32.xlu0 %v2362_v21, %s2656_s25  ;;  %v2427_v21 = vld [vmem:[%s2703_s19 + $0xb2] sm:$0xff] }
 0x1af   : > { %v1302_v22 = vpop.permute.xlu1 %1301  ;;  %v1208_v30 = vpop.permute.xlu0 %1207 }
 0x1b0   : > { %v1720_v48 = vsel %vm1715_vm7, %v1687_v32, %v1302_v22  ;;  %v1704_v8 = vsel %vm1682_vm6, %v1671_v23, %v1208_v30  ;;  %v2380_v22 = vld [vmem:[%s2703_s19 + $0x180] sm:$0xff] }
 0x1b1   : > { %1219 = vrot.lane.b32.xlu1 %v2379_v17, %s2656_s25  ;;  %1187 = vrot.lane.b32.xlu0 %v2363_v28, %s2656_s25  ;;  %v2364_v30 = vld [vmem:[%s2703_s19 + $0xc0] sm:$0xff] }
 0x1b3   : > { %v3771_v10 = vpop.permute.xlu1 %953  ;;  %v1334_v50 = vpop.permute.xlu0 %1333 }
 0x1b4   : > { %v1736_v55 = vsel %vm1715_vm7, %v1703_v18, %v1334_v50  ;;  %v2381_v50 = vld [vmem:[%s2703_s19 + $0x188] sm:$0xff] }
 0x1b5   : > { %1345 = vrot.lane.b32.xlu1 %v2410_v63, %s2657_s30  ;;  %1313 = vrot.lane.b32.xlu0 %v2394_v16, %s2657_s30 }
 0x1b7   : > { %v1336_v3 = vpop.permute.xlu1 %1335  ;;  %v1304_v24 = vpop.permute.xlu0 %1303 }
 0x1b8   : > { %v1737_v4 = vsel %vm1715_vm7, %v1704_v8, %v1336_v3  ;;  %v1721_v47 = vsel %vm1715_vm7, %v1688_v62, %v1304_v24  ;;  %v2365_v3 = vld [vmem:[%s2703_s19 + $0xc8] sm:$0xff] }
 0x1b9   : > { %965 = vrot.lane.b32.xlu1 %v2410_v63, %s2654_s23  ;;  %933 = vrot.lane.b32.xlu0 %v2394_v16, %s2654_s23 }
 0x1bb   : > { %v1462_v27 = vpop.permute.xlu1 %1461  ;;  %v1430_v12 = vpop.permute.xlu0 %1429 }
 0x1bc   : > { %v1769_v51 = vsel %vm1748_vm8, %v1736_v55, %v1462_v27  ;;  %v1753_v49 = vsel %vm1748_vm8, %v1720_v48, %v1430_v12  ;;  %v1639_v48 = vsel %vm1616_vm4, %v3446_v58, %v3771_v10 }
 0x1bd   : > { %1347 = vrot.lane.b32.xlu1 %v2411_v26, %s2657_s30  ;;  %1315 = vrot.lane.b32.xlu0 %v2395_v5, %s2657_s30 }
 0x1be   : > { %2538 = vmatprep.mubr.msk.f32.mxu0 %vm1793_vm9, %v1753_v49  ;;  %2562 = vmatprep.mubr.msk.f32.mxu1 %vm1793_vm9, %v1769_v51  ;;  %v2413_v49 = vld [vmem:[%s2703_s19 + $0x189] sm:$0xff] }
 0x1bf   : > { %v3799_v43 = vpop.permute.xlu1 %955  ;;  %v3801_v42 = vpop.permute.xlu0 %923 }
 0x1c0   : > { %v1640_v8 = vsel %vm1616_vm4, %v3443_v38, %v3799_v43 }
 0x1c1   : > { %1473 = vrot.lane.b32.xlu1 %v2442_v53, %s2658_s10  ;;  %1441 = vrot.lane.b32.xlu0 %v2426_v44, %s2658_s10 }
 0x1c3   : > { %v1082_v11 = vpop.permute.xlu1 %1081  ;;  %v1050_v60 = vpop.permute.xlu0 %1049 }
 0x1c4   : > { %v1672_v55 = vsel %vm1649_vm5, %v1639_v48, %v1082_v11  ;;  %v2415_v48 = vld [vmem:[%s2703_s19 + $0x1a1] sm:$0xff] }
 0x1c5   : > { %967 = vrot.lane.b32.xlu1 %v2411_v26, %s2654_s23  ;;  %935 = vrot.lane.b32.xlu0 %v2395_v5, %s2654_s23  ;;  %v1623_v5 = vsel %vm1616_vm4, %v3318_v52, %v3551_v39  ;;  %v2397_v52 = vld [vmem:[%s2703_s19 + $0xc9] sm:$0xff] }
 0x1c6   : > { %v1656_v27 = vsel %vm1649_vm5, %v1623_v5, %v1050_v60  ;;  %v2444_v60 = vld [vmem:[%s2703_s19 + $0x182] sm:$0xff] }
 0x1c7   : > { %v1464_v9 = vpop.permute.xlu1 %1463  ;;  %v1432_v13 = vpop.permute.xlu0 %1431 }
 0x1c8   : > { %v1770_v29 = vsel %vm1748_vm8, %v1737_v4, %v1464_v9  ;;  %v1754_v61 = vsel %vm1748_vm8, %v1721_v47, %v1432_v13  ;;  %v1624_v4 = vsel %vm1616_vm4, %v3315_v34, %v3801_v42 }
 0x1c9   : > { %1093 = vrot.lane.b32.xlu1 %v2442_v53, %s2655_s24  ;;  %1061 = vrot.lane.b32.xlu0 %v2426_v44, %s2655_s24 }
 0x1ca   : > { %2539 = vmatmul.mubr.msk.f32.gmra.mrb[4].mxu0 %vm1793_vm9, %v1754_v61  ;;  %2563 = vmatmul.mubr.msk.f32.gmra.mrb[4].mxu1 %vm1793_vm9, %v1770_v29 }
 0x1cb   : > { %v1084_v19 = vpop.permute.xlu1 %1083  ;;  %v1052_v2 = vpop.permute.xlu0 %1051 }
 0x1cc   : > { %v1673_v47 = vsel %vm1649_vm5, %v1640_v8, %v1084_v19  ;;  %v1657_v9 = vsel %vm1649_vm5, %v1624_v4, %v1052_v2  ;;  %v2429_v19 = vld [vmem:[%s2703_s19 + $0xca] sm:$0xff] }
 0x1cd   : > { %1475 = vrot.lane.b32.xlu1 %v2443_v41, %s2658_s10  ;;  %1443 = vrot.lane.b32.xlu0 %v2427_v21, %s2658_s10 }
 0x1cf   : > { %v1210_v17 = vpop.permute.xlu1 %1209  ;;  %v1178_v28 = vpop.permute.xlu0 %1177 }
 0x1d0   : > { %v1705_v12 = vsel %vm1682_vm6, %v1672_v55, %v1210_v17  ;;  %v1689_v51 = vsel %vm1682_vm6, %v1656_v27, %v1178_v28  ;;  %v2399_v55 = vld [vmem:[%s2703_s19 + $0xe1] sm:$0xff] }
 0x1d1   : > { %1095 = vrot.lane.b32.xlu1 %v2443_v41, %s2655_s24  ;;  %1063 = vrot.lane.b32.xlu0 %v2427_v21, %s2655_s24  ;;  %v2445_v21 = vld [vmem:[%s2703_s19 + $0x18a] sm:$0xff] }
 0x1d3   : > { %v1212_v63 = vpop.permute.xlu1 %1211  ;;  %v1180_v16 = vpop.permute.xlu0 %1179 }
 0x1d4   : > { %v1706_v13 = vsel %vm1682_vm6, %v1673_v47, %v1212_v63  ;;  %v1690_v29 = vsel %vm1682_vm6, %v1657_v9, %v1180_v16  ;;  %v2366_v63 = vld [vmem:[%s2703_s19 + $0xd8] sm:$0xff] }
 0x1d5   : > { %1221 = vrot.lane.b32.xlu1 %v2380_v22, %s2656_s25  ;;  %1189 = vrot.lane.b32.xlu0 %v2364_v30, %s2656_s25  ;;  %v2382_v30 = vld [vmem:[%s2703_s19 + $0x198] sm:$0xff] }
 0x1d7   : > { %v1338_v24 = vpop.permute.xlu1 %1337  ;;  %v1306_v57 = vpop.permute.xlu0 %1305 }
 0x1d8   : > { %v1738_v39 = vsel %vm1715_vm7, %v1705_v12, %v1338_v24  ;;  %v1722_v58 = vsel %vm1715_vm7, %v1689_v51, %v1306_v57  ;;  %v2367_v24 = vld [vmem:[%s2703_s19 + $0xe0] sm:$0xff] }
 0x1d9   : > { %1223 = vrot.lane.b32.xlu1 %v2381_v50, %s2656_s25  ;;  %1191 = vrot.lane.b32.xlu0 %v2365_v3, %s2656_s25  ;;  %v2383_v3 = vld [vmem:[%s2703_s19 + $0x1a0] sm:$0xff] }
 0x1db   : > { %v3841_v6 = vpop.permute.xlu1 %957  ;;  %v3843_v32 = vpop.permute.xlu0 %925 }
 0x1dc   : > { %v1641_v51 = vsel %vm1616_vm4, %v3466_v54, %v3841_v6  ;;  %v2430_v54 = vld [vmem:[%s2703_s19 + $0xda] sm:$0xff] }
 0x1dd   : > { %1349 = vrot.lane.b32.xlu1 %v2412_v1, %s2657_s30  ;;  %1317 = vrot.lane.b32.xlu0 %v2396_v15, %s2657_s30 }
 0x1df   : > { %v1340_v18 = vpop.permute.xlu1 %1339  ;;  %v1308_v26 = vpop.permute.xlu0 %1307 }
 0x1e0   : > { %v1739_v38 = vsel %vm1715_vm7, %v1706_v13, %v1340_v18  ;;  %v1723_v43 = vsel %vm1715_vm7, %v1690_v29, %v1308_v26  ;;  %v2398_v18 = vld [vmem:[%s2703_s19 + $0xd9] sm:$0xff] }
 0x1e1   : > { %969 = vrot.lane.b32.xlu1 %v2412_v1, %s2654_s23  ;;  %937 = vrot.lane.b32.xlu0 %v2396_v15, %s2654_s23  ;;  %v2414_v15 = vld [vmem:[%s2703_s19 + $0x199] sm:$0xff] }
 0x1e3   : > { %v1466_v10 = vpop.permute.xlu1 %1465  ;;  %v1434_v53 = vpop.permute.xlu0 %1433 }
 0x1e4   : > { %v1771_v44 = vsel %vm1748_vm8, %v1738_v39, %v1466_v10  ;;  %v1755_v11 = vsel %vm1748_vm8, %v1722_v58, %v1434_v53  ;;  %v2446_v53 = vld [vmem:[%s2703_s19 + $0x19a] sm:$0xff] }
 0x1e5   : > { %1351 = vrot.lane.b32.xlu1 %v2413_v49, %s2657_s30  ;;  %1319 = vrot.lane.b32.xlu0 %v2397_v52, %s2657_s30 }
 0x1e6   : > { %2541 = vmatprep.mubr.msk.f32.mxu0 %vm1793_vm9, %v1755_v11  ;;  %2565 = vmatprep.mubr.msk.f32.mxu1 %vm1793_vm9, %v1771_v44 }
 0x1e7   : > { %v3871_v25 = vpop.permute.xlu1 %959  ;;  %v3873_v59 = vpop.permute.xlu0 %927 }
 0x1e8   : > { %v1642_v9 = vsel %vm1616_vm4, %v3463_v46, %v3871_v25  ;;  %v1626_v13 = vsel %vm1616_vm4, %v3335_v31, %v3873_v59 }
 0x1e9   : > { %1477 = vrot.lane.b32.xlu1 %v2444_v60, %s2658_s10  ;;  %1445 = vrot.lane.b32.xlu0 %v2428_v33, %s2658_s10 }
 0x1eb   : > { %v1086_v23 = vpop.permute.xlu1 %1085  ;;  %v1054_v62 = vpop.permute.xlu0 %1053 }
 0x1ed   : > { %971 = vrot.lane.b32.xlu1 %v2413_v49, %s2654_s23  ;;  %939 = vrot.lane.b32.xlu0 %v2397_v52, %s2654_s23  ;;  %v1625_v49 = vsel %vm1616_vm4, %v3338_v20, %v3843_v32  ;;  %v1674_v52 = vsel %vm1649_vm5, %v1641_v51, %v1086_v23  ;;  %v2431_v23 = vld [vmem:[%s2703_s19 + $0xe2] sm:$0xff] }
 0x1ee   : > { %v1658_v39 = vsel %vm1649_vm5, %v1625_v49, %v1054_v62 }
 0x1ef   : > { %v1468_v61 = vpop.permute.xlu1 %1467  ;;  %v1436_v34 = vpop.permute.xlu0 %1435 }
 0x1f0   : > { %v1772_v42 = vsel %vm1748_vm8, %v1739_v38, %v1468_v61  ;;  %v1756_v41 = vsel %vm1748_vm8, %v1723_v43, %v1436_v34 }
 0x1f1   : > { %1097 = vrot.lane.b32.xlu1 %v2444_v60, %s2655_s24  ;;  %1065 = vrot.lane.b32.xlu0 %v2428_v33, %s2655_s24  ;;  %v2447_v33 = vld [vmem:[%s2703_s19 + $0x1a2] sm:$0xff] }
 0x1f2   : > { %2542 = vmatmul.mubr.msk.f32.gmra.mrb[6].mxu0 %vm1793_vm9, %v1756_v41  ;;  %2566 = vmatmul.mubr.msk.f32.gmra.mrb[6].mxu1 %vm1793_vm9, %v1772_v42 }
 0x1f3   : > { %v1088_v2 = vpop.permute.xlu1 %1087  ;;  %v1056_v17 = vpop.permute.xlu0 %1055 }
 0x1f4   : > { %v1675_v29 = vsel %vm1649_vm5, %v1642_v9, %v1088_v2  ;;  %v1659_v38 = vsel %vm1649_vm5, %v1626_v13, %v1056_v17  ;;  %v4001_v13 = vld [vmem:[%s4179_s2] ss:$0 sm:$0xff] }
 0x1f5   : > { %1479 = vrot.lane.b32.xlu1 %v2445_v21, %s2658_s10  ;;  %1447 = vrot.lane.b32.xlu0 %v2429_v19, %s2658_s10 }
 0x1f7   : > { %v1214_v28 = vpop.permute.xlu1 %1213  ;;  %v1182_v22 = vpop.permute.xlu0 %1181 }
 0x1f8   : > { %v1707_v58 = vsel %vm1682_vm6, %v1674_v52, %v1214_v28  ;;  %v1691_v10 = vsel %vm1682_vm6, %v1658_v39, %v1182_v22 }
 0x1f9   : > { %1099 = vrot.lane.b32.xlu1 %v2445_v21, %s2655_s24  ;;  %1067 = vrot.lane.b32.xlu0 %v2429_v19, %s2655_s24 }
 0x1fb   : > { %v1216_v16 = vpop.permute.xlu1 %1215  ;;  %v1184_v50 = vpop.permute.xlu0 %1183 }
 0x1fc   : > { %v1708_v43 = vsel %vm1682_vm6, %v1675_v29, %v1216_v16  ;;  %v1692_v61 = vsel %vm1682_vm6, %v1659_v38, %v1184_v50 }
 0x1fd   : > { %1225 = vrot.lane.b32.xlu1 %v2382_v30, %s2656_s25  ;;  %1193 = vrot.lane.b32.xlu0 %v2366_v63, %s2656_s25 }
 0x1ff   : > { %v1342_v57 = vpop.permute.xlu1 %1341  ;;  %v1310_v1 = vpop.permute.xlu0 %1309 }
 0x200   : > { %v1740_v6 = vsel %vm1715_vm7, %v1707_v58, %v1342_v57  ;;  %v1724_v20 = vsel %vm1715_vm7, %v1691_v10, %v1310_v1 }
 0x201   : > { %1227 = vrot.lane.b32.xlu1 %v2383_v3, %s2656_s25  ;;  %1195 = vrot.lane.b32.xlu0 %v2367_v24, %s2656_s25 }
 0x203   : > { %v3913_v26 = vpop.permute.xlu1 %961  ;;  %v3915_v5 = vpop.permute.xlu0 %929 }
 0x204   : > { %v1643_v24 = vsel %vm1616_vm4, %v3486_v0, %v3913_v26  ;;  %v1627_v57 = vsel %vm1616_vm4, %v3358_v36, %v3915_v5 }
 0x205   : > { %1353 = vrot.lane.b32.xlu1 %v2414_v15, %s2657_s30  ;;  %1321 = vrot.lane.b32.xlu0 %v2398_v18, %s2657_s30 }
 0x207   : > { %v1344_v27 = vpop.permute.xlu1 %1343  ;;  %v1312_v12 = vpop.permute.xlu0 %1311 }
 0x208   : > { %v1741_v34 = vsel %vm1715_vm7, %v1708_v43, %v1344_v27  ;;  %v1725_v42 = vsel %vm1715_vm7, %v1692_v61, %v1312_v12 }
 0x209   : > { %1355 = vrot.lane.b32.xlu1 %v2415_v48, %s2657_s30  ;;  %1323 = vrot.lane.b32.xlu0 %v2399_v55, %s2657_s30 }
 0x20b   : > { %v1470_v32 = vpop.permute.xlu1 %1469  ;;  %v1438_v44 = vpop.permute.xlu0 %1437 }
 0x20c   : > { %v1773_v11 = vsel %vm1748_vm8, %v1740_v6, %v1470_v32  ;;  %v1757_v60 = vsel %vm1748_vm8, %v1724_v20, %v1438_v44 }
 0x20d   : > { %1481 = vrot.lane.b32.xlu1 %v2446_v53, %s2658_s10  ;;  %1449 = vrot.lane.b32.xlu0 %v2430_v54, %s2658_s10 }
 0x20e   : > { %2544 = vmatprep.mubr.msk.f32.mxu0 %vm1793_vm9, %v1757_v60  ;;  %2568 = vmatprep.mubr.msk.f32.mxu1 %vm1793_vm9, %v1773_v11 }
 0x20f   : > { %v964_v62 = vpop.permute.xlu1 %963  ;;  %v932_v8 = vpop.permute.xlu0 %931 }
 0x210   : > { %v1644_v39 = vsel %vm1616_vm4, %v3483_v45, %v964_v62  ;;  %v1628_v58 = vsel %vm1616_vm4, %v3355_v7, %v932_v8 }
 0x211   : > { %1483 = vrot.lane.b32.xlu1 %v2447_v33, %s2658_s10  ;;  %1451 = vrot.lane.b32.xlu0 %v2431_v23, %s2658_s10 }
 0x213   : > { %v1090_v4 = vpop.permute.xlu1 %1089  ;;  %v1058_v47 = vpop.permute.xlu0 %1057 }
 0x214   : > { %v1676_v1 = vsel %vm1649_vm5, %v1643_v24, %v1090_v4  ;;  %v1660_v15 = vsel %vm1649_vm5, %v1627_v57, %v1058_v47 }
 0x217   : > { %v1472_v41 = vpop.permute.xlu1 %1471  ;;  %v1440_v21 = vpop.permute.xlu0 %1439 }
 0x218   : > { %v1774_v46 = vsel %vm1748_vm8, %v1741_v34, %v1472_v41  ;;  %v1758_v25 = vsel %vm1748_vm8, %v1725_v42, %v1440_v21 }
 0x219   : > { %2545 = vmatmul.mubr.msk.f32.gmra.mrb[8].mxu0 %vm1793_vm9, %v1758_v25  ;;  %2569 = vmatmul.mubr.msk.f32.gmra.mrb[8].mxu1 %vm1793_vm9, %v1774_v46 }
 0x21b   : > { %v1092_v31 = vpop.permute.xlu1 %1091  ;;  %v1060_v59 = vpop.permute.xlu0 %1059 }
 0x21c   : > { %v1677_v10 = vsel %vm1649_vm5, %v1644_v39, %v1092_v31  ;;  %v1661_v53 = vsel %vm1649_vm5, %v1628_v58, %v1060_v59 }
 0x21f   : > { %v1218_v19 = vpop.permute.xlu1 %1217  ;;  %v1186_v2 = vpop.permute.xlu0 %1185 }
 0x220   : > { %v1709_v18 = vsel %vm1682_vm6, %v1676_v1, %v1218_v19  ;;  %v1693_v48 = vsel %vm1682_vm6, %v1660_v15, %v1186_v2 }
 0x223   : > { %v1220_v17 = vpop.permute.xlu1 %1219  ;;  %v1188_v28 = vpop.permute.xlu0 %1187 }
 0x224   : > { %v1710_v54 = vsel %vm1682_vm6, %v1677_v10, %v1220_v17  ;;  %v1694_v6 = vsel %vm1682_vm6, %v1661_v53, %v1188_v28 }
 0x227   : > { %v1346_v22 = vpop.permute.xlu1 %1345  ;;  %v1314_v30 = vpop.permute.xlu0 %1313 }
 0x228   : > { %v1742_v55 = vsel %vm1715_vm7, %v1709_v18, %v1346_v22  ;;  %v1726_v27 = vsel %vm1715_vm7, %v1693_v48, %v1314_v30 }
 0x22b   : > { %v966_v63 = vpop.permute.xlu1 %965  ;;  %v934_v16 = vpop.permute.xlu0 %933 }
 0x22c   : > { %v1645_v19 = vsel %vm1616_vm4, %v3506_v14, %v966_v63  ;;  %v1629_v2 = vsel %vm1616_vm4, %v3374_v56, %v934_v16 }
 0x22f   : > { %v1348_v50 = vpop.permute.xlu1 %1347  ;;  %v1316_v3 = vpop.permute.xlu0 %1315 }
 0x230   : > { %v1743_v20 = vsel %vm1715_vm7, %v1710_v54, %v1348_v50  ;;  %v1727_v32 = vsel %vm1715_vm7, %v1694_v6, %v1316_v3 }
 0x233   : > { %v1474_v12 = vpop.permute.xlu1 %1473  ;;  %v1442_v51 = vpop.permute.xlu0 %1441 }
 0x234   : > { %v1775_v0 = vsel %vm1748_vm8, %v1742_v55, %v1474_v12  ;;  %v1759_v26 = vsel %vm1748_vm8, %v1726_v27, %v1442_v51 }
 0x235   : > { %2547 = vmatprep.mubr.msk.f32.mxu0 %vm1793_vm9, %v1759_v26  ;;  %2571 = vmatprep.mubr.msk.f32.mxu1 %vm1793_vm9, %v1775_v0 }
 0x237   : > { %v3979_v36 = vpop.permute.xlu1 %967  ;;  %v3981_v5 = vpop.permute.xlu0 %935 }
 0x238   : > { %v1646_v18 = vsel %vm1616_vm4, %v3503_v35, %v3979_v36  ;;  %v1630_v48 = vsel %vm1616_vm4, %v3371_v40, %v3981_v5 }
 0x23b   : > { %v1094_v49 = vpop.permute.xlu1 %1093  ;;  %v1062_v52 = vpop.permute.xlu0 %1061 }
 0x23c   : > { %v1678_v17 = vsel %vm1649_vm5, %v1645_v19, %v1094_v49  ;;  %v1662_v28 = vsel %vm1649_vm5, %v1629_v2, %v1062_v52 }
 0x23f   : > { %v1476_v44 = vpop.permute.xlu1 %1475  ;;  %v1444_v11 = vpop.permute.xlu0 %1443 }
 0x240   : > { %v1776_v45 = vsel %vm1748_vm8, %v1743_v20, %v1476_v44  ;;  %v1760_v60 = vsel %vm1748_vm8, %v1727_v32, %v1444_v11 }
 0x241   : > { %2548 = vmatmul.mubr.msk.f32.gmra.mrb[10].mxu0 %vm1793_vm9, %v1760_v60  ;;  %2572 = vmatmul.mubr.msk.f32.gmra.mrb[10].mxu1 %vm1793_vm9, %v1776_v45 }
 0x243   : > { %v1096_v7 = vpop.permute.xlu1 %1095  ;;  %v1064_v33 = vpop.permute.xlu0 %1063 }
 0x244   : > { %v1679_v55 = vsel %vm1649_vm5, %v1646_v18, %v1096_v7  ;;  %v1663_v27 = vsel %vm1649_vm5, %v1630_v48, %v1064_v33 }
 0x247   : > { %v1222_v23 = vpop.permute.xlu1 %1221  ;;  %v1190_v62 = vpop.permute.xlu0 %1189 }
 0x248   : > { %v1711_v22 = vsel %vm1682_vm6, %v1678_v17, %v1222_v23  ;;  %v1695_v30 = vsel %vm1682_vm6, %v1662_v28, %v1190_v62 }
 0x24b   : > { %v1224_v8 = vpop.permute.xlu1 %1223  ;;  %v1192_v4 = vpop.permute.xlu0 %1191 }
 0x24c   : > { %v1712_v12 = vsel %vm1682_vm6, %v1679_v55, %v1224_v8  ;;  %v1696_v51 = vsel %vm1682_vm6, %v1663_v27, %v1192_v4  ;;  %v4326_v4 = vld [vmem:[#allocation57_spill] sm:$0xff] }
 0x24f   : > { %v1350_v47 = vpop.permute.xlu1 %1349  ;;  %v1318_v9 = vpop.permute.xlu0 %1317 }
 0x250   : > { %v1744_v50 = vsel %vm1715_vm7, %v1711_v22, %v1350_v47  ;;  %v1728_v3 = vsel %vm1715_vm7, %v1695_v30, %v1318_v9 }
 0x251   : > { %v2534_v29 = vpop.f32.mrb[0].mxu0 }
 0x252   : > { %v1966_v38 = vadd.f32 %v2534_v29, %v4001_v13  ;;  %v1960_v43 = vpop.f32.mrb[1].mxu0 }
 0x253   : > { %v1961_v61 = vadd.f32 %v4001_v13, %v1960_v43  ;;  %v4010_v34 = vpop.permute.xlu1 %969  ;;  %v4012_v42 = vpop.permute.xlu0 %937 }
 0x254   : > { %2120 = vst.msk [vmem:[%s4006_s20 + $0x8] sm:$0xff] %vm1550_vm2, %v1966_v38  ;;  %v1647_v8 = vsel %vm1616_vm4, %v3525_v37, %v4010_v34  ;;  %v1631_v47 = vsel %vm1616_vm4, %v4326_v4, %v4012_v42 }
 0x255   : > { %2119 = vst.msk [vmem:[%s4006_s20] sm:$0xff] %vm1550_vm2, %v1961_v61  ;;  %v2558_v41 = vpop.f32.mrb[0].mxu1 }
 0x256   : > { %v2046_v21 = vadd.f32 %v2558_v41, %v4001_v13  ;;  %v2040_v46 = vpop.f32.mrb[1].mxu1 }
 0x257   : > { %v2041_v25 = vadd.f32 %v4001_v13, %v2040_v46  ;;  %v1352_v31 = vpop.permute.xlu1 %1351  ;;  %v1320_v59 = vpop.permute.xlu0 %1319  ;;  %v4328_v46 = vld [vmem:[#allocation56_spill] sm:$0xff] }
 0x258   : > { %2136 = vst.msk [vmem:[%s4006_s20 + $0x88] sm:$0xff] %vm1550_vm2, %v2046_v21  ;;  %v1745_v0 = vsel %vm1715_vm7, %v1712_v12, %v1352_v31  ;;  %v1729_v26 = vsel %vm1715_vm7, %v1696_v51, %v1320_v59  ;;  %v4327_v21 = vld [vmem:[#allocation22_spill] sm:$0xff] }
 0x259   : > { %2135 = vst.msk [vmem:[%s4006_s20 + $0x80] sm:$0xff] %vm1550_vm2, %v2041_v25 }
 0x25b   : > { %v1478_v14 = vpop.permute.xlu1 %1477  ;;  %v1446_v63 = vpop.permute.xlu0 %1445 }
 0x25c   : > { %v1777_v56 = vsel %vm1748_vm8, %v1744_v50, %v1478_v14  ;;  %v1761_v16 = vsel %vm1748_vm8, %v1728_v3, %v1446_v63 }
 0x25d   : > { %2550 = vmatprep.mubr.msk.f32.mxu0 %vm1793_vm9, %v1761_v16  ;;  %2574 = vmatprep.mubr.msk.f32.mxu1 %vm1793_vm9, %v1777_v56 }
 0x25f   : > { %v972_v24 = vpop.permute.xlu1 %971  ;;  %v940_v57 = vpop.permute.xlu0 %939 }
 0x260   : > { %v1648_v42 = vsel %vm1616_vm4, %v4327_v21, %v972_v24  ;;  %v1632_v25 = vsel %vm1616_vm4, %v4328_v46, %v940_v57 }
 0x263   : > { %v1098_v1 = vpop.permute.xlu1 %1097  ;;  %v1066_v15 = vpop.permute.xlu0 %1065 }
 0x264   : > { %v1680_v9 = vsel %vm1649_vm5, %v1647_v8, %v1098_v1  ;;  %v1664_v29 = vsel %vm1649_vm5, %v1631_v47, %v1066_v15 }
 0x267   : > { %v1480_v49 = vpop.permute.xlu1 %1479  ;;  %v1448_v52 = vpop.permute.xlu0 %1447 }
 0x268   : > { %v1778_v35 = vsel %vm1748_vm8, %v1745_v0, %v1480_v49  ;;  %v1762_v36 = vsel %vm1748_vm8, %v1729_v26, %v1448_v52 }
 0x269   : > { %2551 = vmatmul.mubr.msk.f32.gmra.mrb[12].mxu0 %vm1793_vm9, %v1762_v36  ;;  %2575 = vmatmul.mubr.msk.f32.gmra.mrb[12].mxu1 %vm1793_vm9, %v1778_v35 }
 0x26b   : > { %v1100_v40 = vpop.permute.xlu1 %1099  ;;  %v1068_v5 = vpop.permute.xlu0 %1067 }
 0x26c   : > { %v1681_v19 = vsel %vm1649_vm5, %v1648_v42, %v1100_v40  ;;  %v1665_v2 = vsel %vm1649_vm5, %v1632_v25, %v1068_v5 }
 0x26f   : > { %v1226_v39 = vpop.permute.xlu1 %1225  ;;  %v1194_v58 = vpop.permute.xlu0 %1193 }
 0x270   : > { %v1713_v38 = vsel %vm1682_vm6, %v1680_v9, %v1226_v39  ;;  %v1697_v43 = vsel %vm1682_vm6, %v1664_v29, %v1194_v58 }
 0x273   : > { %v1228_v10 = vpop.permute.xlu1 %1227  ;;  %v1196_v53 = vpop.permute.xlu0 %1195 }
 0x274   : > { %v1714_v17 = vsel %vm1682_vm6, %v1681_v19, %v1228_v10  ;;  %v1698_v28 = vsel %vm1682_vm6, %v1665_v2, %v1196_v53 }
 0x275   : > { %v2537_v54 = vpop.f32.mrb[2].mxu0 }
 0x276   : > { %v1976_v6 = vadd.f32 %v2537_v54, %v4001_v13  ;;  %v1970_v20 = vpop.f32.mrb[3].mxu0 }
 0x277   : > { %v1971_v32 = vadd.f32 %v4001_v13, %v1970_v20  ;;  %v1354_v44 = vpop.permute.xlu1 %1353  ;;  %v1322_v11 = vpop.permute.xlu0 %1321 }
 0x278   : > { %2122 = vst.msk [vmem:[%s4006_s20 + $0x18] sm:$0xff] %vm1550_vm2, %v1976_v6  ;;  %v1746_v61 = vsel %vm1715_vm7, %v1713_v38, %v1354_v44  ;;  %v1730_v37 = vsel %vm1715_vm7, %v1697_v43, %v1322_v11 }
 0x279   : > { %2121 = vst.msk [vmem:[%s4006_s20 + $0x10] sm:$0xff] %vm1550_vm2, %v1971_v32  ;;  %v2561_v45 = vpop.f32.mrb[2].mxu1 }
 0x27a   : > { %v2056_v60 = vadd.f32 %v2561_v45, %v4001_v13  ;;  %v2050_v7 = vpop.f32.mrb[3].mxu1 }
 0x27b   : > { %v2051_v33 = vadd.f32 %v4001_v13, %v2050_v7  ;;  %v1356_v23 = vpop.permute.xlu1 %1355  ;;  %v1324_v62 = vpop.permute.xlu0 %1323 }
 0x27c   : > { %2138 = vst.msk [vmem:[%s4006_s20 + $0x98] sm:$0xff] %vm1550_vm2, %v2056_v60  ;;  %v1747_v22 = vsel %vm1715_vm7, %v1714_v17, %v1356_v23  ;;  %v1731_v30 = vsel %vm1715_vm7, %v1698_v28, %v1324_v62 }
 0x27d   : > { %2137 = vst.msk [vmem:[%s4006_s20 + $0x90] sm:$0xff] %vm1550_vm2, %v2051_v33 }
 0x27f   : > { %v1482_v34 = vpop.permute.xlu1 %1481  ;;  %v1450_v41 = vpop.permute.xlu0 %1449 }
 0x280   : > { %v1779_v31 = vsel %vm1748_vm8, %v1746_v61, %v1482_v34  ;;  %v1763_v59 = vsel %vm1748_vm8, %v1730_v37, %v1450_v41 }
 0x281   : > { %2553 = vmatprep.mubr.msk.f32.mxu0 %vm1793_vm9, %v1763_v59  ;;  %2577 = vmatprep.mubr.msk.f32.mxu1 %vm1793_vm9, %v1779_v31 }
 0x283   : > { %v1484_v50 = vpop.permute.xlu1 %1483  ;;  %v1452_v3 = vpop.permute.xlu0 %1451 }
 0x284   : > { %v1780_v14 = vsel %vm1748_vm8, %v1747_v22, %v1484_v50  ;;  %v1764_v63 = vsel %vm1748_vm8, %v1731_v30, %v1452_v3 }
 0x285   : > { %2554 = vmatmul.mubr.msk.f32.gmra.mrb[14].mxu0 %vm1793_vm9, %v1764_v63  ;;  %2578 = vmatmul.mubr.msk.f32.gmra.mrb[14].mxu1 %vm1793_vm9, %v1780_v14 }
 0x29d   : > { %v2540_v56 = vpop.f32.mrb[4].mxu0  ;;  %v2564_v16 = vpop.f32.mrb[4].mxu1 }
 0x29e   : > { %v1986_v24 = vadd.f32 %v2540_v56, %v4001_v13  ;;  %v2066_v57 = vadd.f32 %v2564_v16, %v4001_v13  ;;  %v1980_v1 = vpop.f32.mrb[5].mxu0  ;;  %v2060_v15 = vpop.f32.mrb[5].mxu1 }
 0x29f   : > { %v1981_v18 = vadd.f32 %v4001_v13, %v1980_v1  ;;  %v2061_v48 = vadd.f32 %v4001_v13, %v2060_v15 }
 0x2a0   : > { %2124 = vst.msk [vmem:[%s4006_s20 + $0x28] sm:$0xff] %vm1550_vm2, %v1986_v24  ;;  %2140 = vst.msk [vmem:[%s4006_s20 + $0xa8] sm:$0xff] %vm1550_vm2, %v2066_v57 }
 0x2a1   : > { %2123 = vst.msk [vmem:[%s4006_s20 + $0x20] sm:$0xff] %vm1550_vm2, %v1981_v18  ;;  %2139 = vst.msk [vmem:[%s4006_s20 + $0xa0] sm:$0xff] %vm1550_vm2, %v2061_v48 }
 0x2c5   : > { %v2543_v55 = vpop.f32.mrb[6].mxu0  ;;  %v2567_v27 = vpop.f32.mrb[6].mxu1 }
 0x2c6   : > { %v1996_v12 = vadd.f32 %v2543_v55, %v4001_v13  ;;  %v2076_v51 = vadd.f32 %v2567_v27, %v4001_v13  ;;  %v1990_v0 = vpop.f32.mrb[7].mxu0  ;;  %v2070_v26 = vpop.f32.mrb[7].mxu1 }
 0x2c7   : > { %v1991_v49 = vadd.f32 %v4001_v13, %v1990_v0  ;;  %v2071_v52 = vadd.f32 %v4001_v13, %v2070_v26 }
 0x2c8   : > { %2126 = vst.msk [vmem:[%s4006_s20 + $0x38] sm:$0xff] %vm1550_vm2, %v1996_v12  ;;  %2142 = vst.msk [vmem:[%s4006_s20 + $0xb8] sm:$0xff] %vm1550_vm2, %v2076_v51 }
 0x2c9   : > { %2125 = vst.msk [vmem:[%s4006_s20 + $0x30] sm:$0xff] %vm1550_vm2, %v1991_v49  ;;  %2141 = vst.msk [vmem:[%s4006_s20 + $0xb0] sm:$0xff] %vm1550_vm2, %v2071_v52 }
 0x2ec   : > { %v2546_v35 = vpop.f32.mrb[8].mxu0  ;;  %v2570_v36 = vpop.f32.mrb[8].mxu1 }
 0x2ed   : > { %v2006_v40 = vadd.f32 %v2546_v35, %v4001_v13  ;;  %v2086_v5 = vadd.f32 %v2570_v36, %v4001_v13  ;;  %v2000_v39 = vpop.f32.mrb[9].mxu0  ;;  %v2080_v58 = vpop.f32.mrb[9].mxu1 }
 0x2ee   : > { %v2001_v10 = vadd.f32 %v4001_v13, %v2000_v39  ;;  %v2081_v53 = vadd.f32 %v4001_v13, %v2080_v58 }
 0x2ef   : > { %2128 = vst.msk [vmem:[%s4006_s20 + $0x48] sm:$0xff] %vm1550_vm2, %v2006_v40  ;;  %2144 = vst.msk [vmem:[%s4006_s20 + $0xc8] sm:$0xff] %vm1550_vm2, %v2086_v5 }
 0x2f0   : > { %2127 = vst.msk [vmem:[%s4006_s20 + $0x40] sm:$0xff] %vm1550_vm2, %v2001_v10  ;;  %2143 = vst.msk [vmem:[%s4006_s20 + $0xc0] sm:$0xff] %vm1550_vm2, %v2081_v53 }
 0x314   : > { %v2549_v54 = vpop.f32.mrb[10].mxu0  ;;  %v2573_v6 = vpop.f32.mrb[10].mxu1 }
 0x315   : > { %v2016_v20 = vadd.f32 %v2549_v54, %v4001_v13  ;;  %v2096_v32 = vadd.f32 %v2573_v6, %v4001_v13  ;;  %v2010_v44 = vpop.f32.mrb[11].mxu0  ;;  %v2090_v11 = vpop.f32.mrb[11].mxu1 }
 0x316   : > { %v2011_v45 = vadd.f32 %v4001_v13, %v2010_v44  ;;  %v2091_v60 = vadd.f32 %v4001_v13, %v2090_v11 }
 0x317   : > { %2130 = vst.msk [vmem:[%s4006_s20 + $0x58] sm:$0xff] %vm1550_vm2, %v2016_v20  ;;  %2146 = vst.msk [vmem:[%s4006_s20 + $0xd8] sm:$0xff] %vm1550_vm2, %v2096_v32 }
 0x318   : > { %2129 = vst.msk [vmem:[%s4006_s20 + $0x50] sm:$0xff] %vm1550_vm2, %v2011_v45  ;;  %2145 = vst.msk [vmem:[%s4006_s20 + $0xd0] sm:$0xff] %vm1550_vm2, %v2091_v60 }
 0x33c   : > { %v2552_v7 = vpop.f32.mrb[12].mxu0  ;;  %v2576_v33 = vpop.f32.mrb[12].mxu1 }
 0x33d   : > { %v2026_v23 = vadd.f32 %v2552_v7, %v4001_v13  ;;  %v2106_v62 = vadd.f32 %v2576_v33, %v4001_v13  ;;  %v2020_v8 = vpop.f32.mrb[13].mxu0  ;;  %v2100_v4 = vpop.f32.mrb[13].mxu1 }
 0x33e   : > { %v2021_v47 = vadd.f32 %v4001_v13, %v2020_v8  ;;  %v2101_v9 = vadd.f32 %v4001_v13, %v2100_v4 }
 0x33f   : > { %2132 = vst.msk [vmem:[%s4006_s20 + $0x68] sm:$0xff] %vm1550_vm2, %v2026_v23  ;;  %2148 = vst.msk [vmem:[%s4006_s20 + $0xe8] sm:$0xff] %vm1550_vm2, %v2106_v62 }
 0x340   : > { %2131 = vst.msk [vmem:[%s4006_s20 + $0x60] sm:$0xff] %vm1550_vm2, %v2021_v47  ;;  %2147 = vst.msk [vmem:[%s4006_s20 + $0xe0] sm:$0xff] %vm1550_vm2, %v2101_v9 }
 0x358   : > { %v2555_v29 = vpop.f32.mrb[14].mxu0  ;;  %v2579_v38 = vpop.f32.mrb[14].mxu1 }
 0x359   : > { %v2036_v43 = vadd.f32 %v2555_v29, %v4001_v13  ;;  %v2116_v61 = vadd.f32 %v2579_v38, %v4001_v13  ;;  %v2030_v37 = vpop.f32.mrb[15].mxu0  ;;  %v2110_v34 = vpop.f32.mrb[15].mxu1 }
 0x35a   : > { %v2031_v41 = vadd.f32 %v4001_v13, %v2030_v37  ;;  %v2111_v21 = vadd.f32 %v4001_v13, %v2110_v34 }
 0x35b   : > { %2134 = vst.msk [vmem:[%s4006_s20 + $0x78] sm:$0xff] %vm1550_vm2, %v2036_v43  ;;  %2150 = vst.msk [vmem:[%s4006_s20 + $0xf8] sm:$0xff] %vm1550_vm2, %v2116_v61 }
 0x35c   : > { %2133 = vst.msk [vmem:[%s4006_s20 + $0x70] sm:$0xff] %vm1550_vm2, %v2031_v41  ;;  %2149 = vst.msk [vmem:[%s4006_s20 + $0xf0] sm:$0xff] %vm1550_vm2, %v2111_v21 }
 0x35d PF: > { %s13_s14 = sadd.s32 1, %s2649_s14   ;;  %s4329_s12 = smov %s2645_s13 }
 0x35e   : > { %p10_p5 = scmp.ge.s32.totalorder %s13_s14, 4   ;;  %s4330_s13 = smov %s4332_s15 }
 0x360   :  { %12 = sbr.rel (!%p10_p5) target bundleno = 2 (0x2), region = 65 }

</bundles_post_ra>
